<compile_context>
chip_gen: v7x
topology: tpu7x:2x2x1
jax: 0.10.0
libtpu: 0.0.40
codegen_flags: <defaults>
</compile_context>

<pallas_src>
import jax
import jax.numpy as jnp
import numpy as np
from jax import lax
from jax.experimental import pallas as pl
from jax.experimental.pallas import tpu as pltpu

AVG_POOL_K = 31
AVG_POOL_PAD = 15
_WIN = float(AVG_POOL_K * AVG_POOL_K)  # 961


def _structure_loss_kernel(pred_ref, mask_ref, bce_ref, inter_ref, union_ref):
    TB, H, W = pred_ref.shape

    # 0/1 band matrices implementing the 31x31 box window-sum as two matmuls.
    # Built in-kernel (iota + compare: a handful of VPU vreg ops) so they never
    # touch HBM and occupy no pipeline buffers.  bf16 is exact for 0/1 entries.
    ih = lax.broadcasted_iota(jnp.int32, (H, H), 0)
    jh = lax.broadcasted_iota(jnp.int32, (H, H), 1)
    bh = (jnp.abs(ih - jh) <= AVG_POOL_PAD).astype(jnp.bfloat16)
    iw = lax.broadcasted_iota(jnp.int32, (W, W), 0)
    jw = lax.broadcasted_iota(jnp.int32, (W, W), 1)
    bw = (jnp.abs(iw - jw) <= AVG_POOL_PAD).astype(jnp.bfloat16)

    lane = lax.broadcasted_iota(jnp.int32, (1, TB), 1)
    zeros = jnp.zeros((1, TB), jnp.float32)

    def body(b, carry):
        bce_acc, inter_acc, union_acc = carry
        pred_b = pred_ref[b].astype(jnp.float32)          # (H, W)
        mask_b = mask_ref[b].astype(jnp.float32)          # (H, W)

        # window SUM = Bh @ mask @ Bw  (exact in bf16 for binary masks)
        row = jnp.dot(mask_b.astype(jnp.bfloat16), bw,
                      preferred_element_type=jnp.float32)
        pool_sum = jnp.dot(bh, row.astype(jnp.bfloat16),
                           preferred_element_type=jnp.float32)

        # weit = 1 + 5*|avg_pool - mask|   (1/961 folded into the scale)
        weit = 1.0 + (5.0 / _WIN) * jnp.abs(pool_sum - _WIN * mask_b)

        pm = pred_b * mask_b                               # reused for `inter`
        # numerically-stable elementwise BCE-with-logits
        bce = (jnp.maximum(pred_b, 0.0) - pm
               + jnp.log(1.0 + jnp.exp(-jnp.abs(pred_b))))

        sel = (lane == b).astype(jnp.float32)              # one-hot over TB lanes
        bce_acc = bce_acc + sel * jnp.sum(bce)
        inter_acc = inter_acc + sel * jnp.sum(pm * weit)
        union_acc = union_acc + sel * jnp.sum((pred_b + mask_b) * weit)
        return bce_acc, inter_acc, union_acc

    bce_acc, inter_acc, union_acc = lax.fori_loop(
        0, TB, body, (zeros, zeros, zeros), unroll=True)

    bce_ref[0] = bce_acc
    inter_ref[0] = inter_acc
    union_ref[0] = union_acc


def structure_loss(pred, mask):
    """pred, mask: (N, C, H, W) arrays (NCHW, like PyTorch).  Returns scalar loss."""
    N, C, H, W = pred.shape
    B = N * C
    # No wrapper-side astype / pad: reshape is free, dtype handling happens in-kernel,
    # and TB is chosen to divide B exactly so no padded HBM copies are created.
    p = pred.reshape(B, H, W)
    m = mask.reshape(B, H, W)

    # ---- maps-per-step (TB) selection --------------------------------------
    try:
        vmem_cap = int(pltpu.get_tpu_info().vmem_capacity_bytes)
    except Exception:
        vmem_cap = 64 * 1024 * 1024                  # conservative (v7x per-TC)
    budget = vmem_cap // 2                           # headroom for Mosaic internals
    ip = jnp.dtype(p.dtype).itemsize
    im = jnp.dtype(m.dtype).itemsize
    per_map_bytes = 2 * (ip + im) * H * W            # double-buffered pipeline inputs
    fixed_bytes = 10 * H * W * 4 + 2 * (H * H + W * W)   # per-map loop temps + bands
    cap = int(min(B, 8, max(1, (budget - fixed_bytes) // per_map_bytes)))
    divisors = [d for d in range(1, cap + 1) if B % d == 0]
    TB = max(divisors)
    if B > 1 and B // TB < 2:                        # keep >=2 grid steps (v7x megacore)
        smaller = [d for d in divisors if B // d >= 2]
        if smaller:
            TB = max(smaller)
    nb = B // TB

    bce_p, inter_p, union_p = pl.pallas_call(
        _structure_loss_kernel,
        out_shape=(jax.ShapeDtypeStruct((nb, 1, TB), jnp.float32),
                   jax.ShapeDtypeStruct((nb, 1, TB), jnp.float32),
                   jax.ShapeDtypeStruct((nb, 1, TB), jnp.float32)),
        grid_spec=pltpu.PrefetchScalarGridSpec(
            num_scalar_prefetch=0,
            grid=(nb,),
            in_specs=[
                pl.BlockSpec((TB, H, W), lambda i: (i, 0, 0)),   # pred maps
                pl.BlockSpec((TB, H, W), lambda i: (i, 0, 0)),   # mask maps
            ],
            out_specs=[
                pl.BlockSpec((1, 1, TB), lambda i: (i, 0, 0)),   # per-map BCE sums
                pl.BlockSpec((1, 1, TB), lambda i: (i, 0, 0)),   # per-map inter sums
                pl.BlockSpec((1, 1, TB), lambda i: (i, 0, 0)),   # per-map union sums
            ],
        ),
        compiler_params=pltpu.CompilerParams(
            dimension_semantics=("parallel",),       # disjoint outputs per step
            vmem_limit_bytes=int(min(vmem_cap * 3 // 4, 100 * 1024 * 1024)),
        ),
    )(p, m)

    # ---- tiny final reduction in JAX ----------------------------------------
    bce_sum = jnp.sum(bce_p)
    inter = inter_p.reshape(B)
    union = union_p.reshape(B)

    # PyTorch quirk: reduce='none' -> legacy 'mean' reduction -> scalar wbce,
    # and (weit*wbce).sum / weit.sum == wbce for every (n, c) map.
    wbce = bce_sum / jnp.float32(B * H * W)
    wiou = 1.0 - (inter + 1.0) / (union - inter + 1.0)
    return wbce + jnp.mean(wiou)


def _structure_loss_ref(pred, mask):
    """Pure-JAX reference reproducing PyTorch semantics (incl. reduce='none' quirk)."""
    pred = pred.astype(jnp.float32)
    mask = mask.astype(jnp.float32)
    pool = lax.reduce_window(
        mask, 0.0, lax.add,
        window_dimensions=(1, 1, AVG_POOL_K, AVG_POOL_K),
        window_strides=(1, 1, 1, 1),
        padding=((0, 0), (0, 0), (AVG_POOL_PAD, AVG_POOL_PAD),
                 (AVG_POOL_PAD, AVG_POOL_PAD)),
    ) / _WIN
    weit = 1.0 + 5.0 * jnp.abs(pool - mask)
    bce = (jnp.maximum(pred, 0.0) - pred * mask
           + jnp.log1p(jnp.exp(-jnp.abs(pred))))
    wbce = jnp.mean(bce)                                        # scalar (legacy 'mean')
    wbce_nc = (weit * wbce).sum(axis=(2, 3)) / weit.sum(axis=(2, 3))  # == wbce
    inter = (pred * mask * weit).sum(axis=(2, 3))
    union = ((pred + mask) * weit).sum(axis=(2, 3))
    wiou = 1.0 - (inter + 1.0) / (union - inter + 1.0)
    return jnp.mean(wbce_nc + wiou)


if __name__ == "__main__":
    key = jax.random.PRNGKey(0)
    k1, k2 = jax.random.split(key)
    N, C, H, W = 2, 4, 16, 16
    pred = jax.random.normal(k1, (N, C, H, W), dtype=jnp.float32)
    mask = (jax.random.uniform(k2, (N, C, H, W)) > 0.5).astype(jnp.float32)

    loss = jax.block_until_ready(structure_loss(pred, mask))
    loss_ref = jax.block_until_ready(_structure_loss_ref(pred, mask))

    np.testing.assert_allclose(np.asarray(loss), np.asarray(loss_ref),
                               rtol=1e-4, atol=1e-4)
    print("KERNEL_OK")
</pallas_src>

<mosaic_0001>
module attributes {stable_mosaic.version = 11 : i64} {
  func.func @_structure_loss_kernel(%arg0: i32, %arg1: memref<4x16x16xf32, #tpu.memory_space<vmem>>, %arg2: memref<4x16x16xf32, #tpu.memory_space<vmem>>, %arg3: memref<1x1x4xf32, #tpu.memory_space<vmem>>, %arg4: memref<1x1x4xf32, #tpu.memory_space<vmem>>, %arg5: memref<1x1x4xf32, #tpu.memory_space<vmem>>) attributes {dimension_semantics = [#tpu.dimension_semantics<parallel>], iteration_bounds = array<i64: 2>, scalar_prefetch = 0 : i64, scratch_operands = 0 : i64, tpu.core_type = #tpu.core_type<tc>, window_params = [{transform_indices = @transform_0, window_bounds = array<i64: 4, 16, 16>}, {transform_indices = @transform_1, window_bounds = array<i64: 4, 16, 16>}, {transform_indices = @transform_2, window_bounds = array<i64: 1, 1, 4>}, {transform_indices = @transform_3, window_bounds = array<i64: 1, 1, 4>}, {transform_indices = @transform_4, window_bounds = array<i64: 1, 1, 4>}]} {
    %0 = tpu.iota {dimensions = array<i32: 0>} : vector<16x16xi32>
    %1 = tpu.iota {dimensions = array<i32: 1>} : vector<16x16xi32>
    %2 = arith.subi %0, %1 : vector<16x16xi32>
    %3 = math.absi %2 : vector<16x16xi32>
    %c15_i32 = arith.constant 15 : i32
    %4 = vector.broadcast %c15_i32 : i32 to vector<16x16xi32>
    %5 = arith.cmpi sle, %3, %4 : vector<16x16xi32>
    %6 = arith.extui %5 : vector<16x16xi1> to vector<16x16xi32>
    %7 = arith.sitofp %6 : vector<16x16xi32> to vector<16x16xf32>
    %8 = arith.truncf %7 : vector<16x16xf32> to vector<16x16xbf16>
    %9 = tpu.iota {dimensions = array<i32: 0>} : vector<16x16xi32>
    %10 = tpu.iota {dimensions = array<i32: 1>} : vector<16x16xi32>
    %11 = arith.subi %9, %10 : vector<16x16xi32>
    %12 = math.absi %11 : vector<16x16xi32>
    %c15_i32_0 = arith.constant 15 : i32
    %13 = vector.broadcast %c15_i32_0 : i32 to vector<16x16xi32>
    %14 = arith.cmpi sle, %12, %13 : vector<16x16xi32>
    %15 = arith.extui %14 : vector<16x16xi1> to vector<16x16xi32>
    %16 = arith.sitofp %15 : vector<16x16xi32> to vector<16x16xf32>
    %17 = arith.truncf %16 : vector<16x16xf32> to vector<16x16xbf16>
    %18 = tpu.iota {dimensions = array<i32: 1>} : vector<1x4xi32>
    %cst = arith.constant 0.000000e+00 : f32
    %19 = vector.broadcast %cst : f32 to vector<1x4xf32>
    %c0_i32 = arith.constant 0 : i32
    %20 = arith.index_cast %c0_i32 : i32 to index
    %c0 = arith.constant 0 : index
    %c0_1 = arith.constant 0 : index
    %21 = vector.load %arg1[%20, %c0, %c0_1] : memref<4x16x16xf32, #tpu.memory_space<vmem>>, vector<1x16x16xf32>
    %22 = vector.shape_cast %21 : vector<1x16x16xf32> to vector<16x16xf32>
    %23 = arith.index_cast %c0_i32 : i32 to index
    %c0_2 = arith.constant 0 : index
    %c0_3 = arith.constant 0 : index
    %24 = vector.load %arg2[%23, %c0_2, %c0_3] : memref<4x16x16xf32, #tpu.memory_space<vmem>>, vector<1x16x16xf32>
    %25 = vector.shape_cast %24 : vector<1x16x16xf32> to vector<16x16xf32>
    %26 = arith.truncf %25 : vector<16x16xf32> to vector<16x16xbf16>
    %cst_4 = arith.constant dense<0.000000e+00> : vector<16x16xf32>
    %27 = tpu.matmul %26, %17, %cst_4 {dimension_numbers = #tpu.dot_dimension_numbers<[1], [0], [0], [1], [0, 0, 1, 1], [], []>} : vector<16x16xbf16>, vector<16x16xbf16>, vector<16x16xf32> -> vector<16x16xf32>
    %28 = arith.truncf %27 : vector<16x16xf32> to vector<16x16xbf16>
    %cst_5 = arith.constant dense<0.000000e+00> : vector<16x16xf32>
    %29 = tpu.matmul %8, %28, %cst_5 {dimension_numbers = #tpu.dot_dimension_numbers<[1], [0], [0], [1], [0, 0, 1, 1], [], []>} : vector<16x16xbf16>, vector<16x16xbf16>, vector<16x16xf32> -> vector<16x16xf32>
    %cst_6 = arith.constant 9.610000e+02 : f32
    %30 = vector.broadcast %cst_6 : f32 to vector<16x16xf32>
    %31 = arith.mulf %30, %25 : vector<16x16xf32>
    %32 = arith.subf %29, %31 : vector<16x16xf32>
    %33 = math.absf %32 : vector<16x16xf32>
    %cst_7 = arith.constant 0.00520291366 : f32
    %34 = vector.broadcast %cst_7 : f32 to vector<16x16xf32>
    %35 = arith.mulf %34, %33 : vector<16x16xf32>
    %cst_8 = arith.constant 1.000000e+00 : f32
    %36 = vector.broadcast %cst_8 : f32 to vector<16x16xf32>
    %37 = arith.addf %36, %35 : vector<16x16xf32>
    %38 = arith.mulf %22, %25 : vector<16x16xf32>
    %cst_9 = arith.constant 0.000000e+00 : f32
    %39 = vector.broadcast %cst_9 : f32 to vector<16x16xf32>
    %40 = arith.maximumf %22, %39 : vector<16x16xf32>
    %41 = arith.subf %40, %38 : vector<16x16xf32>
    %42 = math.absf %22 : vector<16x16xf32>
    %cst_10 = arith.constant 0.000000e+00 : f32
    %43 = vector.broadcast %cst_10 : f32 to vector<16x16xf32>
    %44 = arith.subf %43, %42 : vector<16x16xf32>
    %45 = math.exp %44 : vector<16x16xf32>
    %cst_11 = arith.constant 1.000000e+00 : f32
    %46 = vector.broadcast %cst_11 : f32 to vector<16x16xf32>
    %47 = arith.addf %46, %45 : vector<16x16xf32>
    %48 = math.log %47 : vector<16x16xf32>
    %49 = arith.addf %41, %48 : vector<16x16xf32>
    %50 = vector.broadcast %c0_i32 : i32 to vector<1x4xi32>
    %51 = arith.cmpi eq, %18, %50 : vector<1x4xi32>
    %52 = arith.extui %51 : vector<1x4xi1> to vector<1x4xi32>
    %53 = arith.sitofp %52 : vector<1x4xi32> to vector<1x4xf32>
    %54 = vector.shape_cast %49 : vector<16x16xf32> to vector<1x16x16xf32>
    %cst_12 = arith.constant dense<0.000000e+00> : vector<1xf32>
    %55 = vector.multi_reduction <add>, %54, %cst_12 [1, 2] : vector<1x16x16xf32> to vector<1xf32>
    %56 = vector.shape_cast %55 : vector<1xf32> to vector<1x1x1xf32>
    %57 = vector.extract %56[0, 0, 0] : f32 from vector<1x1x1xf32>
    %58 = vector.broadcast %57 : f32 to vector<1x4xf32>
    %59 = arith.mulf %53, %58 : vector<1x4xf32>
    %60 = arith.addf %19, %59 : vector<1x4xf32>
    %61 = arith.mulf %38, %37 : vector<16x16xf32>
    %62 = vector.shape_cast %61 : vector<16x16xf32> to vector<1x16x16xf32>
    %cst_13 = arith.constant dense<0.000000e+00> : vector<1xf32>
    %63 = vector.multi_reduction <add>, %62, %cst_13 [1, 2] : vector<1x16x16xf32> to vector<1xf32>
    %64 = vector.shape_cast %63 : vector<1xf32> to vector<1x1x1xf32>
    %65 = vector.extract %64[0, 0, 0] : f32 from vector<1x1x1xf32>
    %66 = vector.broadcast %65 : f32 to vector<1x4xf32>
    %67 = arith.mulf %53, %66 : vector<1x4xf32>
    %68 = arith.addf %19, %67 : vector<1x4xf32>
    %69 = arith.addf %22, %25 : vector<16x16xf32>
    %70 = arith.mulf %69, %37 : vector<16x16xf32>
    %71 = vector.shape_cast %70 : vector<16x16xf32> to vector<1x16x16xf32>
    %cst_14 = arith.constant dense<0.000000e+00> : vector<1xf32>
    %72 = vector.multi_reduction <add>, %71, %cst_14 [1, 2] : vector<1x16x16xf32> to vector<1xf32>
    %73 = vector.shape_cast %72 : vector<1xf32> to vector<1x1x1xf32>
    %74 = vector.extract %73[0, 0, 0] : f32 from vector<1x1x1xf32>
    %75 = vector.broadcast %74 : f32 to vector<1x4xf32>
    %76 = arith.mulf %53, %75 : vector<1x4xf32>
    %77 = arith.addf %19, %76 : vector<1x4xf32>
    %c1_i32 = arith.constant 1 : i32
    %78 = arith.index_cast %c1_i32 : i32 to index
    %c0_15 = arith.constant 0 : index
    %c0_16 = arith.constant 0 : index
    %79 = vector.load %arg1[%78, %c0_15, %c0_16] : memref<4x16x16xf32, #tpu.memory_space<vmem>>, vector<1x16x16xf32>
    %80 = vector.shape_cast %79 : vector<1x16x16xf32> to vector<16x16xf32>
    %81 = arith.index_cast %c1_i32 : i32 to index
    %c0_17 = arith.constant 0 : index
    %c0_18 = arith.constant 0 : index
    %82 = vector.load %arg2[%81, %c0_17, %c0_18] : memref<4x16x16xf32, #tpu.memory_space<vmem>>, vector<1x16x16xf32>
    %83 = vector.shape_cast %82 : vector<1x16x16xf32> to vector<16x16xf32>
    %84 = arith.truncf %83 : vector<16x16xf32> to vector<16x16xbf16>
    %cst_19 = arith.constant dense<0.000000e+00> : vector<16x16xf32>
    %85 = tpu.matmul %84, %17, %cst_19 {dimension_numbers = #tpu.dot_dimension_numbers<[1], [0], [0], [1], [0, 0, 1, 1], [], []>} : vector<16x16xbf16>, vector<16x16xbf16>, vector<16x16xf32> -> vector<16x16xf32>
    %86 = arith.truncf %85 : vector<16x16xf32> to vector<16x16xbf16>
    %cst_20 = arith.constant dense<0.000000e+00> : vector<16x16xf32>
    %87 = tpu.matmul %8, %86, %cst_20 {dimension_numbers = #tpu.dot_dimension_numbers<[1], [0], [0], [1], [0, 0, 1, 1], [], []>} : vector<16x16xbf16>, vector<16x16xbf16>, vector<16x16xf32> -> vector<16x16xf32>
    %cst_21 = arith.constant 9.610000e+02 : f32
    %88 = vector.broadcast %cst_21 : f32 to vector<16x16xf32>
    %89 = arith.mulf %88, %83 : vector<16x16xf32>
    %90 = arith.subf %87, %89 : vector<16x16xf32>
    %91 = math.absf %90 : vector<16x16xf32>
    %cst_22 = arith.constant 0.00520291366 : f32
    %92 = vector.broadcast %cst_22 : f32 to vector<16x16xf32>
    %93 = arith.mulf %92, %91 : vector<16x16xf32>
    %cst_23 = arith.constant 1.000000e+00 : f32
    %94 = vector.broadcast %cst_23 : f32 to vector<16x16xf32>
    %95 = arith.addf %94, %93 : vector<16x16xf32>
    %96 = arith.mulf %80, %83 : vector<16x16xf32>
    %cst_24 = arith.constant 0.000000e+00 : f32
    %97 = vector.broadcast %cst_24 : f32 to vector<16x16xf32>
    %98 = arith.maximumf %80, %97 : vector<16x16xf32>
    %99 = arith.subf %98, %96 : vector<16x16xf32>
    %100 = math.absf %80 : vector<16x16xf32>
    %cst_25 = arith.constant 0.000000e+00 : f32
    %101 = vector.broadcast %cst_25 : f32 to vector<16x16xf32>
    %102 = arith.subf %101, %100 : vector<16x16xf32>
    %103 = math.exp %102 : vector<16x16xf32>
    %cst_26 = arith.constant 1.000000e+00 : f32
    %104 = vector.broadcast %cst_26 : f32 to vector<16x16xf32>
    %105 = arith.addf %104, %103 : vector<16x16xf32>
    %106 = math.log %105 : vector<16x16xf32>
    %107 = arith.addf %99, %106 : vector<16x16xf32>
    %108 = vector.broadcast %c1_i32 : i32 to vector<1x4xi32>
    %109 = arith.cmpi eq, %18, %108 : vector<1x4xi32>
    %110 = arith.extui %109 : vector<1x4xi1> to vector<1x4xi32>
    %111 = arith.sitofp %110 : vector<1x4xi32> to vector<1x4xf32>
    %112 = vector.shape_cast %107 : vector<16x16xf32> to vector<1x16x16xf32>
    %cst_27 = arith.constant dense<0.000000e+00> : vector<1xf32>
    %113 = vector.multi_reduction <add>, %112, %cst_27 [1, 2] : vector<1x16x16xf32> to vector<1xf32>
    %114 = vector.shape_cast %113 : vector<1xf32> to vector<1x1x1xf32>
    %115 = vector.extract %114[0, 0, 0] : f32 from vector<1x1x1xf32>
    %116 = vector.broadcast %115 : f32 to vector<1x4xf32>
    %117 = arith.mulf %111, %116 : vector<1x4xf32>
    %118 = arith.addf %60, %117 : vector<1x4xf32>
    %119 = arith.mulf %96, %95 : vector<16x16xf32>
    %120 = vector.shape_cast %119 : vector<16x16xf32> to vector<1x16x16xf32>
    %cst_28 = arith.constant dense<0.000000e+00> : vector<1xf32>
    %121 = vector.multi_reduction <add>, %120, %cst_28 [1, 2] : vector<1x16x16xf32> to vector<1xf32>
    %122 = vector.shape_cast %121 : vector<1xf32> to vector<1x1x1xf32>
    %123 = vector.extract %122[0, 0, 0] : f32 from vector<1x1x1xf32>
    %124 = vector.broadcast %123 : f32 to vector<1x4xf32>
    %125 = arith.mulf %111, %124 : vector<1x4xf32>
    %126 = arith.addf %68, %125 : vector<1x4xf32>
    %127 = arith.addf %80, %83 : vector<16x16xf32>
    %128 = arith.mulf %127, %95 : vector<16x16xf32>
    %129 = vector.shape_cast %128 : vector<16x16xf32> to vector<1x16x16xf32>
    %cst_29 = arith.constant dense<0.000000e+00> : vector<1xf32>
    %130 = vector.multi_reduction <add>, %129, %cst_29 [1, 2] : vector<1x16x16xf32> to vector<1xf32>
    %131 = vector.shape_cast %130 : vector<1xf32> to vector<1x1x1xf32>
    %132 = vector.extract %131[0, 0, 0] : f32 from vector<1x1x1xf32>
    %133 = vector.broadcast %132 : f32 to vector<1x4xf32>
    %134 = arith.mulf %111, %133 : vector<1x4xf32>
    %135 = arith.addf %77, %134 : vector<1x4xf32>
    %c2_i32 = arith.constant 2 : i32
    %136 = arith.index_cast %c2_i32 : i32 to index
    %c0_30 = arith.constant 0 : index
    %c0_31 = arith.constant 0 : index
    %137 = vector.load %arg1[%136, %c0_30, %c0_31] : memref<4x16x16xf32, #tpu.memory_space<vmem>>, vector<1x16x16xf32>
    %138 = vector.shape_cast %137 : vector<1x16x16xf32> to vector<16x16xf32>
    %139 = arith.index_cast %c2_i32 : i32 to index
    %c0_32 = arith.constant 0 : index
    %c0_33 = arith.constant 0 : index
    %140 = vector.load %arg2[%139, %c0_32, %c0_33] : memref<4x16x16xf32, #tpu.memory_space<vmem>>, vector<1x16x16xf32>
    %141 = vector.shape_cast %140 : vector<1x16x16xf32> to vector<16x16xf32>
    %142 = arith.truncf %141 : vector<16x16xf32> to vector<16x16xbf16>
    %cst_34 = arith.constant dense<0.000000e+00> : vector<16x16xf32>
    %143 = tpu.matmul %142, %17, %cst_34 {dimension_numbers = #tpu.dot_dimension_numbers<[1], [0], [0], [1], [0, 0, 1, 1], [], []>} : vector<16x16xbf16>, vector<16x16xbf16>, vector<16x16xf32> -> vector<16x16xf32>
    %144 = arith.truncf %143 : vector<16x16xf32> to vector<16x16xbf16>
    %cst_35 = arith.constant dense<0.000000e+00> : vector<16x16xf32>
    %145 = tpu.matmul %8, %144, %cst_35 {dimension_numbers = #tpu.dot_dimension_numbers<[1], [0], [0], [1], [0, 0, 1, 1], [], []>} : vector<16x16xbf16>, vector<16x16xbf16>, vector<16x16xf32> -> vector<16x16xf32>
    %cst_36 = arith.constant 9.610000e+02 : f32
    %146 = vector.broadcast %cst_36 : f32 to vector<16x16xf32>
    %147 = arith.mulf %146, %141 : vector<16x16xf32>
    %148 = arith.subf %145, %147 : vector<16x16xf32>
    %149 = math.absf %148 : vector<16x16xf32>
    %cst_37 = arith.constant 0.00520291366 : f32
    %150 = vector.broadcast %cst_37 : f32 to vector<16x16xf32>
    %151 = arith.mulf %150, %149 : vector<16x16xf32>
    %cst_38 = arith.constant 1.000000e+00 : f32
    %152 = vector.broadcast %cst_38 : f32 to vector<16x16xf32>
    %153 = arith.addf %152, %151 : vector<16x16xf32>
    %154 = arith.mulf %138, %141 : vector<16x16xf32>
    %cst_39 = arith.constant 0.000000e+00 : f32
    %155 = vector.broadcast %cst_39 : f32 to vector<16x16xf32>
    %156 = arith.maximumf %138, %155 : vector<16x16xf32>
    %157 = arith.subf %156, %154 : vector<16x16xf32>
    %158 = math.absf %138 : vector<16x16xf32>
    %cst_40 = arith.constant 0.000000e+00 : f32
    %159 = vector.broadcast %cst_40 : f32 to vector<16x16xf32>
    %160 = arith.subf %159, %158 : vector<16x16xf32>
    %161 = math.exp %160 : vector<16x16xf32>
    %cst_41 = arith.constant 1.000000e+00 : f32
    %162 = vector.broadcast %cst_41 : f32 to vector<16x16xf32>
    %163 = arith.addf %162, %161 : vector<16x16xf32>
    %164 = math.log %163 : vector<16x16xf32>
    %165 = arith.addf %157, %164 : vector<16x16xf32>
    %166 = vector.broadcast %c2_i32 : i32 to vector<1x4xi32>
    %167 = arith.cmpi eq, %18, %166 : vector<1x4xi32>
    %168 = arith.extui %167 : vector<1x4xi1> to vector<1x4xi32>
    %169 = arith.sitofp %168 : vector<1x4xi32> to vector<1x4xf32>
    %170 = vector.shape_cast %165 : vector<16x16xf32> to vector<1x16x16xf32>
    %cst_42 = arith.constant dense<0.000000e+00> : vector<1xf32>
    %171 = vector.multi_reduction <add>, %170, %cst_42 [1, 2] : vector<1x16x16xf32> to vector<1xf32>
    %172 = vector.shape_cast %171 : vector<1xf32> to vector<1x1x1xf32>
    %173 = vector.extract %172[0, 0, 0] : f32 from vector<1x1x1xf32>
    %174 = vector.broadcast %173 : f32 to vector<1x4xf32>
    %175 = arith.mulf %169, %174 : vector<1x4xf32>
    %176 = arith.addf %118, %175 : vector<1x4xf32>
    %177 = arith.mulf %154, %153 : vector<16x16xf32>
    %178 = vector.shape_cast %177 : vector<16x16xf32> to vector<1x16x16xf32>
    %cst_43 = arith.constant dense<0.000000e+00> : vector<1xf32>
    %179 = vector.multi_reduction <add>, %178, %cst_43 [1, 2] : vector<1x16x16xf32> to vector<1xf32>
    %180 = vector.shape_cast %179 : vector<1xf32> to vector<1x1x1xf32>
    %181 = vector.extract %180[0, 0, 0] : f32 from vector<1x1x1xf32>
    %182 = vector.broadcast %181 : f32 to vector<1x4xf32>
    %183 = arith.mulf %169, %182 : vector<1x4xf32>
    %184 = arith.addf %126, %183 : vector<1x4xf32>
    %185 = arith.addf %138, %141 : vector<16x16xf32>
    %186 = arith.mulf %185, %153 : vector<16x16xf32>
    %187 = vector.shape_cast %186 : vector<16x16xf32> to vector<1x16x16xf32>
    %cst_44 = arith.constant dense<0.000000e+00> : vector<1xf32>
    %188 = vector.multi_reduction <add>, %187, %cst_44 [1, 2] : vector<1x16x16xf32> to vector<1xf32>
    %189 = vector.shape_cast %188 : vector<1xf32> to vector<1x1x1xf32>
    %190 = vector.extract %189[0, 0, 0] : f32 from vector<1x1x1xf32>
    %191 = vector.broadcast %190 : f32 to vector<1x4xf32>
    %192 = arith.mulf %169, %191 : vector<1x4xf32>
    %193 = arith.addf %135, %192 : vector<1x4xf32>
    %c3_i32 = arith.constant 3 : i32
    %194 = arith.index_cast %c3_i32 : i32 to index
    %c0_45 = arith.constant 0 : index
    %c0_46 = arith.constant 0 : index
    %195 = vector.load %arg1[%194, %c0_45, %c0_46] : memref<4x16x16xf32, #tpu.memory_space<vmem>>, vector<1x16x16xf32>
    %196 = vector.shape_cast %195 : vector<1x16x16xf32> to vector<16x16xf32>
    %197 = arith.index_cast %c3_i32 : i32 to index
    %c0_47 = arith.constant 0 : index
    %c0_48 = arith.constant 0 : index
    %198 = vector.load %arg2[%197, %c0_47, %c0_48] : memref<4x16x16xf32, #tpu.memory_space<vmem>>, vector<1x16x16xf32>
    %199 = vector.shape_cast %198 : vector<1x16x16xf32> to vector<16x16xf32>
    %200 = arith.truncf %199 : vector<16x16xf32> to vector<16x16xbf16>
    %cst_49 = arith.constant dense<0.000000e+00> : vector<16x16xf32>
    %201 = tpu.matmul %200, %17, %cst_49 {dimension_numbers = #tpu.dot_dimension_numbers<[1], [0], [0], [1], [0, 0, 1, 1], [], []>} : vector<16x16xbf16>, vector<16x16xbf16>, vector<16x16xf32> -> vector<16x16xf32>
    %202 = arith.truncf %201 : vector<16x16xf32> to vector<16x16xbf16>
    %cst_50 = arith.constant dense<0.000000e+00> : vector<16x16xf32>
    %203 = tpu.matmul %8, %202, %cst_50 {dimension_numbers = #tpu.dot_dimension_numbers<[1], [0], [0], [1], [0, 0, 1, 1], [], []>} : vector<16x16xbf16>, vector<16x16xbf16>, vector<16x16xf32> -> vector<16x16xf32>
    %cst_51 = arith.constant 9.610000e+02 : f32
    %204 = vector.broadcast %cst_51 : f32 to vector<16x16xf32>
    %205 = arith.mulf %204, %199 : vector<16x16xf32>
    %206 = arith.subf %203, %205 : vector<16x16xf32>
    %207 = math.absf %206 : vector<16x16xf32>
    %cst_52 = arith.constant 0.00520291366 : f32
    %208 = vector.broadcast %cst_52 : f32 to vector<16x16xf32>
    %209 = arith.mulf %208, %207 : vector<16x16xf32>
    %cst_53 = arith.constant 1.000000e+00 : f32
    %210 = vector.broadcast %cst_53 : f32 to vector<16x16xf32>
    %211 = arith.addf %210, %209 : vector<16x16xf32>
    %212 = arith.mulf %196, %199 : vector<16x16xf32>
    %cst_54 = arith.constant 0.000000e+00 : f32
    %213 = vector.broadcast %cst_54 : f32 to vector<16x16xf32>
    %214 = arith.maximumf %196, %213 : vector<16x16xf32>
    %215 = arith.subf %214, %212 : vector<16x16xf32>
    %216 = math.absf %196 : vector<16x16xf32>
    %cst_55 = arith.constant 0.000000e+00 : f32
    %217 = vector.broadcast %cst_55 : f32 to vector<16x16xf32>
    %218 = arith.subf %217, %216 : vector<16x16xf32>
    %219 = math.exp %218 : vector<16x16xf32>
    %cst_56 = arith.constant 1.000000e+00 : f32
    %220 = vector.broadcast %cst_56 : f32 to vector<16x16xf32>
    %221 = arith.addf %220, %219 : vector<16x16xf32>
    %222 = math.log %221 : vector<16x16xf32>
    %223 = arith.addf %215, %222 : vector<16x16xf32>
    %224 = vector.broadcast %c3_i32 : i32 to vector<1x4xi32>
    %225 = arith.cmpi eq, %18, %224 : vector<1x4xi32>
    %226 = arith.extui %225 : vector<1x4xi1> to vector<1x4xi32>
    %227 = arith.sitofp %226 : vector<1x4xi32> to vector<1x4xf32>
    %228 = vector.shape_cast %223 : vector<16x16xf32> to vector<1x16x16xf32>
    %cst_57 = arith.constant dense<0.000000e+00> : vector<1xf32>
    %229 = vector.multi_reduction <add>, %228, %cst_57 [1, 2] : vector<1x16x16xf32> to vector<1xf32>
    %230 = vector.shape_cast %229 : vector<1xf32> to vector<1x1x1xf32>
    %231 = vector.extract %230[0, 0, 0] : f32 from vector<1x1x1xf32>
    %232 = vector.broadcast %231 : f32 to vector<1x4xf32>
    %233 = arith.mulf %227, %232 : vector<1x4xf32>
    %234 = arith.addf %176, %233 : vector<1x4xf32>
    %235 = arith.mulf %212, %211 : vector<16x16xf32>
    %236 = vector.shape_cast %235 : vector<16x16xf32> to vector<1x16x16xf32>
    %cst_58 = arith.constant dense<0.000000e+00> : vector<1xf32>
    %237 = vector.multi_reduction <add>, %236, %cst_58 [1, 2] : vector<1x16x16xf32> to vector<1xf32>
    %238 = vector.shape_cast %237 : vector<1xf32> to vector<1x1x1xf32>
    %239 = vector.extract %238[0, 0, 0] : f32 from vector<1x1x1xf32>
    %240 = vector.broadcast %239 : f32 to vector<1x4xf32>
    %241 = arith.mulf %227, %240 : vector<1x4xf32>
    %242 = arith.addf %184, %241 : vector<1x4xf32>
    %243 = arith.addf %196, %199 : vector<16x16xf32>
    %244 = arith.mulf %243, %211 : vector<16x16xf32>
    %245 = vector.shape_cast %244 : vector<16x16xf32> to vector<1x16x16xf32>
    %cst_59 = arith.constant dense<0.000000e+00> : vector<1xf32>
    %246 = vector.multi_reduction <add>, %245, %cst_59 [1, 2] : vector<1x16x16xf32> to vector<1xf32>
    %247 = vector.shape_cast %246 : vector<1xf32> to vector<1x1x1xf32>
    %248 = vector.extract %247[0, 0, 0] : f32 from vector<1x1x1xf32>
    %249 = vector.broadcast %248 : f32 to vector<1x4xf32>
    %250 = arith.mulf %227, %249 : vector<1x4xf32>
    %251 = arith.addf %193, %250 : vector<1x4xf32>
    %c4_i32 = arith.constant 4 : i32
    %c0_60 = arith.constant 0 : index
    %c0_61 = arith.constant 0 : index
    %c0_62 = arith.constant 0 : index
    %252 = vector.load %arg3[%c0_60, %c0_61, %c0_62] : memref<1x1x4xf32, #tpu.memory_space<vmem>>, vector<1x1x4xf32>
    %253 = vector.shape_cast %252 : vector<1x1x4xf32> to vector<1x4xf32>
    %254 = vector.shape_cast %234 : vector<1x4xf32> to vector<1x1x4xf32>
    tpu.vector_store %arg3[%c0_60, %c0_61, %c0_62], %254 {strides = array<i32>} : memref<1x1x4xf32, #tpu.memory_space<vmem>>, vector<1x1x4xf32>,
    %c0_63 = arith.constant 0 : index
    %c0_64 = arith.constant 0 : index
    %c0_65 = arith.constant 0 : index
    %255 = vector.load %arg4[%c0_63, %c0_64, %c0_65] : memref<1x1x4xf32, #tpu.memory_space<vmem>>, vector<1x1x4xf32>
    %256 = vector.shape_cast %255 : vector<1x1x4xf32> to vector<1x4xf32>
    %257 = vector.shape_cast %242 : vector<1x4xf32> to vector<1x1x4xf32>
    tpu.vector_store %arg4[%c0_63, %c0_64, %c0_65], %257 {strides = array<i32>} : memref<1x1x4xf32, #tpu.memory_space<vmem>>, vector<1x1x4xf32>,
    %c0_66 = arith.constant 0 : index
    %c0_67 = arith.constant 0 : index
    %c0_68 = arith.constant 0 : index
    %258 = vector.load %arg5[%c0_66, %c0_67, %c0_68] : memref<1x1x4xf32, #tpu.memory_space<vmem>>, vector<1x1x4xf32>
    %259 = vector.shape_cast %258 : vector<1x1x4xf32> to vector<1x4xf32>
    %260 = vector.shape_cast %251 : vector<1x4xf32> to vector<1x1x4xf32>
    tpu.vector_store %arg5[%c0_66, %c0_67, %c0_68], %260 {strides = array<i32>} : memref<1x1x4xf32, #tpu.memory_space<vmem>>, vector<1x1x4xf32>,
    return
  }
  func.func @transform_0(%arg0: i32) -> (i32, i32, i32) {
    %c0_i32 = arith.constant 0 : i32
    %c0_i32_0 = arith.constant 0 : i32
    %c0_i32_1 = arith.constant 0 : i32
    return %arg0, %c0_i32, %c0_i32_0 : i32, i32, i32
  }
  func.func @transform_1(%arg0: i32) -> (i32, i32, i32) {
    %c0_i32 = arith.constant 0 : i32
    %c0_i32_0 = arith.constant 0 : i32
    %c0_i32_1 = arith.constant 0 : i32
    return %arg0, %c0_i32, %c0_i32_0 : i32, i32, i32
  }
  func.func @transform_2(%arg0: i32) -> (i32, i32, i32) {
    %c0_i32 = arith.constant 0 : i32
    %c0_i32_0 = arith.constant 0 : i32
    %c0_i32_1 = arith.constant 0 : i32
    return %arg0, %c0_i32, %c0_i32_0 : i32, i32, i32
  }
  func.func @transform_3(%arg0: i32) -> (i32, i32, i32) {
    %c0_i32 = arith.constant 0 : i32
    %c0_i32_0 = arith.constant 0 : i32
    %c0_i32_1 = arith.constant 0 : i32
    return %arg0, %c0_i32, %c0_i32_0 : i32, i32, i32
  }
  func.func @transform_4(%arg0: i32) -> (i32, i32, i32) {
    %c0_i32 = arith.constant 0 : i32
    %c0_i32_0 = arith.constant 0 : i32
    %c0_i32_1 = arith.constant 0 : i32
    return %arg0, %c0_i32, %c0_i32_0 : i32, i32, i32
  }
}

</mosaic_0001>

<bundles_post_ra>
// kernel: tpu_custom_call.1
= control target key start
LH: loop header
LB: loop body
LE: loop exit
PB: predicated region body
PF: predicated region fallthrough
CT: control target
= control target key end

     0   :  { %10 = vsyncpa [#allocation3], 0  ;;  %s2239_s0 = inlined_call_operand.hbm [shape: f32[8,16,16], index: 0, kind: input, shape index: {}]   ;;  %s2240_s1 = inlined_call_operand.hbm [shape: f32[8,16,16], index: 1, kind: input, shape index: {}]   ;;  %s2241_s2 = inlined_call_operand.hbm [shape: f32[2,1,4], index: 2, kind: output, shape index: {0}]   ;;  %s2242_s3 = inlined_call_operand.hbm [shape: f32[2,1,4], index: 3, kind: output, shape index: {1}]   ;;  %s2243_s4 = inlined_call_operand.hbm [shape: f32[2,1,4], index: 4, kind: output, shape index: {2}]  }
   0x1   :  { %12 = vsyncpa [#allocation3 + $0x1], 0 }
   0x2   :  { %13 = vsyncpa [#allocation6], 0 }
   0x3   :  { %15 = vsyncpa [#allocation6 + $0x1], 0 }
   0x4   :  { %16 = vsyncpa [#allocation4], 0 }
   0x5   :  { %18 = vsyncpa [#allocation4 + $0x1], 0 }
   0x6   :  { %19 = vsyncpa [#allocation9], 0 }
   0x7   :  { %21 = vsyncpa [#allocation9 + $0x1], 0  ;;  %s1679_s15 = smov 0   ;;  %s1681_s16 = smov 0  }
   0x8   :  { %s1683_s17 = smov 0   ;;  %s1685_s18 = smov 0  }
   0x9 LB: > { %s1700_s19 = sadd.s32 4294967295, %s1642_s18   ;;  %s2245_s20 = sadd.s32 4294967294, %s1642_s18   ;;  %s1642_s18 = sphi %s1685_s18, %s2265_s18   ;;  %s1638_s17 = sphi %s1683_s17, %s2264_s17   ;;  %s1634_s16 = sphi %s1681_s16, %s2263_s16   ;;  %s1630_s15 = sphi %s1679_s15, %s2262_s15  }
   0xa   : > { %s1704_s21 = sadd.s32 1, %s1642_s18   ;;  %s34_s22 = sadd.s32 1, %s1638_s17 }
   0xb   : > { %s31_s23 = ssub.s32 %s1642_s18, %s1704_s21  ;;  %p41_p0 = scmp.ne.s32.totalorder %s1638_s17, %s1634_s16 }
   0xc   : > { %p32_p1 = scmp.eq.s32.totalorder %s31_s23, 0  ;;  %p42_p2 = scmp.eq.s32.totalorder %s1642_s18, 0 }
   0xd   : > { %p47_p3 = scmp.ne.s32.totalorder %s1634_s16, %s1630_s15  ;;  %p48_p4 = scmp.eq.s32.totalorder %s1700_s19, 0 }
   0xe   : > { %s1716_s24 = scalar_select %p32_p1, %s1638_s17, %s34_s22  }
   0xf   : > { %p1718_p5 = por %p42_p2, %p41_p0  ;;  %p1722_p6 = por %p48_p4, %p47_p3 }
  0x10   : > { %p97_p7 = scmp.eq.s32.totalorder %s1700_s19, 1  ;;  %p103_p8 = scmp.eq.s32.totalorder %s2245_s20, 1 }
  0x11   : > { %s2249_s26 = scalar_select %p1722_p6, 1, 0 }
  0x12   : > { %p1381_p10 = scmp.lt.s32.totalorder %s1642_s18, 2  ;;  %p1731_p11 = por %p97_p7, %p41_p0 }
  0x13   : > { %p1735_p12 = por %p103_p8, %p47_p3  ;;  %s1740_s29 = sand.u32 1, %s1638_s17  }
  0x14   : > { %s2250_s27 = scalar_select %p1731_p11, 1, 0 }
  0x15   : > { %s2251_s28 = scalar_select %p1735_p12, 1, 0 }
  0x16   : > { %s1263_s30 = sshll.u32 %s1642_s18, 10  ;;  %s1210_s5 = sshll.u32 %s1740_s29, 6 }
  0x17   : > { %s1749_s8 = scalar_lea.hbm %s2239_s0, %s1263_s30  ;;  %s179_s9 = scalar_lea.vmem [#allocation2], %s1210_s5 }
  0x18   : > { %s187_s10 = sshll.u32 %s179_s9, 4  ;;  %p1755_p13 = pnand %p1381_p10, %p1718_p5  ;;  %s1759_s10 = int_to_ptr.vmem [resolvable:$true] %s187_s10 }
  0x19   : > { %s176_s12 = scalar_lea.sflag [#allocation3], %s1740_s29  ;;  %s1452_s13 = scalar_lea.hbm %s1749_s8, 1024 }
  0x1a   : > { %p1453_p0 = scmp.ne.s32.totalorder %s1749_s8, %s1452_s13  ;;  %p1454_p1 = pneg %p1755_p13 }
  0x1b   : > { %s1457_s23 = scalar_lea.hbm %s2239_s0, 2048  ;;  %p1458_p4 = scmp.lt.u32.totalorder %s1749_s8, %s2239_s0 }
  0x1c   : > { %p1455_p2 = pnand %p1454_p1, %p1453_p0  ;;  %p1459_p5 = scmp.lt.u32.totalorder %s1457_s23, %s1452_s13 }
  0x1d   : > { %p1461_p8 = scmp.lt.u32.totalorder %s1452_s13, %s1749_s8 }
  0x1e   : > { %p1456_p3 = pneg %p1455_p2  ;;  %p1460_p7 = por %p1459_p5, %p1458_p4 }
  0x20   : > { %p1462_p10 = por %p1461_p8, %p1460_p7 }
  0x22   : > { %p1463_p9 = pnand %p1462_p10, %p1456_p3 }
  0x24   : > { %1466 = shalt.err (!%p1463_p9)
}
  0x25   : > { %s1467_s7 = scalar_lea.vmem %s1759_s10, 1024  ;;  %s1644_s9 = smov [#allocation2]  }
  0x26   : > { %p1468_p0 = scmp.ne.s32.totalorder %s1759_s10, %s1467_s7  ;;  %s1472_s14 = sshll.u32 %s1644_s9, 4  ;;  %s1473_s14 = int_to_ptr.vmem [resolvable:$false] %s1472_s14 }
  0x27   : > { %s1474_s22 = scalar_lea.vmem %s1473_s14, 2048  ;;  %p1475_p11 = scmp.lt.s32.totalorder %s1759_s10, %s1473_s14 }
  0x28   : > { %p1470_p2 = pnand %p1468_p0, %p1454_p1  ;;  %p1476_p4 = scmp.lt.s32.totalorder %s1474_s22, %s1467_s7 }
  0x2a   : > { %p1471_p12 = pneg %p1470_p2  ;;  %p1477_p5 = por %p1476_p4, %p1475_p11 }
  0x2c   : > { %p1478_p7 = pnand %p1477_p5, %p1471_p12 }
  0x2e   : > { %1481 = shalt.err (!%p1478_p7)
}
  0x2f   : > { %s1645_s13 = smov 128   ;;  %s1646_s23 = smov 8  }
  0x30   : > { %1367 = dma.hbm_to_vmem [thread:$0]  (!%p1755_p13), %s1749_s8, 1024, %s1759_s10, %s176_s12, %s1645_s13, %s1645_s13, %s1646_s23  }
  0x31   : > { %p1218_p9 = scmp.ge.s32.totalorder %s1642_s18, 1  ;;  %p217_p11 = scmp.lt.s32.totalorder %s1642_s18, 3 }
  0x32   : > { %s1803_s9 = scalar_lea.hbm %s2240_s1, %s1263_s30  ;;  %s201_s14 = scalar_lea.vmem [#allocation5], %s1210_s5 }
  0x33   : > { %p1794_p12 = pnand %p1218_p9, %p217_p11  ;;  %s209_s22 = sshll.u32 %s201_s14, 4  ;;  %s1807_s22 = int_to_ptr.vmem [resolvable:$true] %s209_s22 }
  0x34   : > { %s198_s8 = scalar_lea.sflag [#allocation6], %s1740_s29  ;;  %s1482_s10 = scalar_lea.hbm %s1803_s9, 1024 }
  0x35   : > { %p1483_p3 = scmp.ne.s32.totalorder %s1803_s9, %s1482_s10  ;;  %s1487_s30 = scalar_lea.hbm %s2240_s1, 2048 }
  0x36   : > { %p1488_p0 = scmp.lt.u32.totalorder %s1803_s9, %s2240_s1  ;;  %p1489_p2 = scmp.lt.u32.totalorder %s1487_s30, %s1482_s10 }
  0x37   : > { %p1485_p8 = pnand %p1483_p3, %p1454_p1  ;;  %p1491_p5 = scmp.lt.u32.totalorder %s1482_s10, %s1803_s9 }
  0x38   : > { %p1490_p4 = por %p1489_p2, %p1488_p0 }
  0x39   : > { %p1486_p10 = pneg %p1485_p8 }
  0x3a   : > { %p1492_p7 = por %p1491_p5, %p1490_p4 }
  0x3c   : > { %p1493_p9 = pnand %p1492_p7, %p1486_p10 }
  0x3e   : > { %1496 = shalt.err (!%p1493_p9)
}
  0x3f   : > { %s1497_s5 = scalar_lea.vmem %s1807_s22, 1024  ;;  %s1647_s14 = smov [#allocation5]  }
  0x40   : > { %p1498_p11 = scmp.ne.s32.totalorder %s1807_s22, %s1497_s5  ;;  %s1502_s12 = sshll.u32 %s1647_s14, 4  ;;  %s1503_s12 = int_to_ptr.vmem [resolvable:$false] %s1502_s12 }
  0x41   : > { %s1504_s20 = scalar_lea.vmem %s1503_s12, 2048  ;;  %p1505_p6 = scmp.lt.s32.totalorder %s1807_s22, %s1503_s12 }
  0x42   : > { %p1500_p3 = pnand %p1498_p11, %p1454_p1  ;;  %p1506_p0 = scmp.lt.s32.totalorder %s1504_s20, %s1497_s5 }
  0x44   : > { %p1501_p8 = pneg %p1500_p3  ;;  %p1507_p2 = por %p1506_p0, %p1505_p6 }
  0x46   : > { %p1508_p4 = pnand %p1507_p2, %p1501_p8 }
  0x48   : > { %1511 = shalt.err (!%p1508_p4)
}
  0x49   : > { %1370 = dma.hbm_to_vmem [thread:$0]  (!%p1755_p13), %s1803_s9, 1024, %s1807_s22, %s198_s8, %s1645_s13, %s1645_s13, %s1646_s23  }
  0x4a   : > { %221 = sbr.rel (%p1794_p12) target bundleno = 842 (0x34a), region = 28  ;;  %s1841_s10 = sand.u32 (!%p1794_p12), 1, %s1634_s16  }
  0x4b   : > { %s1219_s6 = sshll.u32 (!%p1794_p12), %s1841_s10, 6  ;;  %s224_s30 = scalar_lea.sflag (!%p1794_p12), [#allocation3], %s1841_s10 }
  0x4c   : > { %s1845_s11 = scalar_lea.vmem (!%p1794_p12), [#allocation2], %s1219_s6  ;;  %p2254_p6 = scmp.ne.s32.totalorder (!%p1794_p12), %s2249_s26, 0 }
  0x51   : > { %1613 = dma.done.wait (%p2254_p6), %s224_s30, 1024  }
  0x52   : > { %1615 = vsyncadd (%p2254_p6), %s224_s30, 4294966272  ;;  %s233_s29 = scalar_lea.sflag [#allocation6], %s1841_s10  ;;  %s1852_s13 = scalar_lea.vmem [#allocation5], %s1219_s6 }
  0x53   : > { %1617 = dma.done.wait (%p2254_p6), %s233_s29, 1024  }
  0x54   : > { %1619 = vsyncadd (%p2254_p6), %s233_s29, 4294966272  ;;  %v276_v0 = vlaneseq  ;;  %v1648_v1 = vmov 0.0   ;;  %vm1649_vm0 = vmmov 0   ;;  %v1869_v11 = vld [vmem:[%s1852_s13] sm:$0xff]  ;;  %v1872_v12 = vld [vmem:[%s1852_s13 + $0x8] sm:$0xff]  ;;  %vm301_vm4 = vcmask 130048  }
  0x55   : > { %1282 = vmatprep.subr.bf16.mxu0 %v1648_v1  ;;  %1284 = vmatprep.mubr.msk.bf16.mxu0 %vm1649_vm0, %v1648_v1  ;;  %v300_v16 = vpack.c.bf16 %v1872_v12, %v1869_v11  ;;  %v1650_v18 = vmov 1.0|1.0   ;;  %v1891_v19 = vld [vmem:[%s1852_s13 + $0x10] sm:$0xff]  ;;  %v1894_v20 = vld [vmem:[%s1852_s13 + $0x18] sm:$0xff]  ;;  %v1905_v22 = vld [vmem:[%s1852_s13 + $0x20] sm:$0xff]  ;;  %s2097_s20 = sshll.u32 %s1700_s19, 4 }
  0x56   : > { %v277_v2 = vshrl.u32 %v276_v0, 7  ;;  %v1861_v3 = vand.u32 127, %v276_v0  ;;  %1288 = vmatprep.subr.bf16.mxu1 %v1648_v1  ;;  %1290 = vmatprep.mubr.msk.bf16.mxu1 %vm1649_vm0, %v1648_v1  ;;  %v483_v21 = vpack.c.bf16 %v1894_v20, %v1891_v19  ;;  %v1908_v23 = vld [vmem:[%s1852_s13 + $0x28] sm:$0xff]  ;;  %v1919_v25 = vld [vmem:[%s1852_s13 + $0x30] sm:$0xff]  ;;  %v1922_v26 = vld [vmem:[%s1852_s13 + $0x38] sm:$0xff]  ;;  %s260_s6 = scalar_lea.vmem [#allocation7], %s1841_s10 }
  0x57   : > { %v662_v24 = vpack.c.bf16 %v1908_v23, %v1905_v22  ;;  %v841_v27 = vpack.c.bf16 %v1922_v26, %v1919_v25  ;;  %v1941_v48 = vld [vmem:[%s1845_s11] sm:$0xff]  ;;  %v1944_v49 = vld [vmem:[%s1845_s11 + $0x8] sm:$0xff]  ;;  %v1947_v50 = vld [vmem:[%s1845_s11 + $0x10] sm:$0xff]  ;;  %s1039_s30 = sshll.u32 %s260_s6, 4  ;;  %vm1014_vm9 = vcmask 24576   ;;  %p2257_p1 = scmp.ne.s32.totalorder %s2250_s27, 0  ;;  %s2107_s30 = int_to_ptr.vmem [resolvable:$true] %s1039_s30 }
  0x58   : > { %v278_v4 = vadd.s32 8, %v277_v2  ;;  %v281_v5 = vsub.s32 %v277_v2, %v1861_v3  ;;  %v1950_v51 = vld [vmem:[%s1845_s11 + $0x18] sm:$0xff]  ;;  %v586_v52 = vand.u32 2147483647, %v1947_v50  ;;  %v407_v54 = vand.u32 2147483647, %v1941_v48 }
  0x59   : > { %v587_v53 = vand.u32 2147483647, %v1950_v51  ;;  %v408_v55 = vand.u32 2147483647, %v1944_v49  ;;  %v1957_v60 = vld [vmem:[%s1845_s11 + $0x30] sm:$0xff]  ;;  %v1960_v61 = vld [vmem:[%s1845_s11 + $0x38] sm:$0xff] }
  0x5a   : > { %v282_v6 = vsub.s32 %v278_v4, %v1861_v3  ;;  %v284_v7 = vsub.s32 0, %v281_v5  ;;  %v588_v56 = vsub.f32 0.0, %v586_v52  ;;  %v409_v58 = vsub.f32 0.0, %v407_v54  ;;  %v1963_v62 = vld [vmem:[%s1845_s11 + $0x20] sm:$0xff] }
  0x5b   : > { %v589_v57 = vsub.f32 0.0, %v587_v53  ;;  %v410_v59 = vsub.f32 0.0, %v408_v55  ;;  %v583_v52 = vmax.f32 %v1950_v51, 0.0  ;;  %v403_v53 = vmax.f32 %v1941_v48, 0.0 }
  0x5c   : > { %v1221_v8 = vmin.u32 %v284_v7, %v281_v5  ;;  %v287_v9 = vsub.s32 0, %v282_v6  ;;  %v590_v63 = vmul.f32 1.442695, %v588_v56  ;;  %v411_v2 = vmul.f32 1.442695, %v409_v58  ;;  %v1968_v7 = vld [vmem:[%s1845_s11 + $0x28] sm:$0xff] }
  0x5d   : > { %v592_v0 = vmul.f32 1.442695, %v589_v57  ;;  %v413_v4 = vmul.f32 1.442695, %v410_v59  ;;  %v944_v5 = vand.u32 2147483647, %v1957_v60 }
  0x5e   : > { %v1222_v10 = vmin.u32 %v287_v9, %v282_v6  ;;  %vm289_vm1 = vcmp.le.s32.totalorder %v1221_v8, 15  ;;  %v945_v6 = vand.u32 2147483647, %v1960_v61  ;;  %1420 = vpow2.f32 %v590_v63  ;;  %s1022_s11 = sand.u32 1, %s1700_s19  }
  0x5f   : > { %v1223_v13 = vsel %vm289_vm1, 1.0, %v1648_v1  ;;  %v765_v8 = vand.u32 2147483647, %v1963_v62  ;;  %1422 = vpow2.f32 %v592_v0  ;;  %v946_v9 = vsub.f32 0.0, %v944_v5 }
  0x60   : > { %vm290_vm2 = vcmp.le.s32.totalorder %v1222_v10, 15  ;;  %v947_v10 = vsub.f32 0.0, %v945_v6  ;;  %1424 = vpow2.f32 %v411_v2  ;;  %v404_v56 = vmax.f32 %v1944_v49, 0.0 }
  0x61   : > { %v1224_v14 = vsel %vm290_vm2, 1.0, %v1648_v1  ;;  %vm1876_vm3 = vmpackc.low %vm290_vm2, %vm289_vm1  ;;  %1426 = vpow2.f32 %v413_v4  ;;  %v948_v15 = vmul.f32 1.442695, %v946_v9  ;;  %v1998_v6 = vmul.f32 %v1919_v25, %v1957_v60 }
  0x62   : > { %v295_v17 = vpack.c.bf16 %v1224_v14, %v1223_v13  ;;  %1283 = vmatpush3.bf16.msk.msra.mxu0 %vm1876_vm3, %v1650_v18  ;;  %v766_v13 = vand.u32 2147483647, %v1968_v7  ;;  %v767_v14 = vsub.f32 0.0, %v765_v8  ;;  %v2002_v8 = vmul.f32 %v1922_v26, %v1960_v61 }
  0x63   : > { %1294 = vmatprep.subr.bf16.mxu0 %v1648_v1  ;;  %1428 = vpow2.f32 %v948_v15  ;;  %vm602_vm5 = vcmp.eq.s32.totalorder %v1861_v3, 1  ;;  %vm423_vm6 = vcmp.eq.s32.totalorder %v1861_v3, 0  ;;  %vm781_vm7 = vcmp.eq.s32.totalorder %v1861_v3, 2 }
  0x64   : > { %vm960_vm8 = vcmp.eq.s32.totalorder %v1861_v3, 3 }
  0x65   : > { %1285 = vmatmul.mubr.msk.bf16.vlgmr.msra.gmra.mrb[0].mxu0 %vm301_vm4, %v300_v16  ;;  %v950_v16 = vmul.f32 1.442695, %v947_v10 }
  0x66   : > { %1295 = vmatpush3.bf16.msk.msra.mxu0 %vm1876_vm3, %v1650_v18  ;;  %1296 = vmatprep.mubr.msk.bf16.mxu0 %vm1649_vm0, %v1648_v1 }
  0x67   : > { %1306 = vmatprep.subr.bf16.mxu0 %v1648_v1  ;;  %1430 = vpow2.f32 %v950_v16 }
  0x6d   : > { %1297 = vmatmul.mubr.msk.bf16.vlgmr.msra.gmra.mrb[4].mxu0 %vm301_vm4, %v483_v21 }
  0x6e   : > { %1307 = vmatpush3.bf16.msk.msra.mxu0 %vm1876_vm3, %v1650_v18  ;;  %1308 = vmatprep.mubr.msk.bf16.mxu0 %vm1649_vm0, %v1648_v1 }
  0x6f   : > { %1318 = vmatprep.subr.bf16.mxu0 %v1648_v1 }
  0x75   : > { %1309 = vmatmul.mubr.msk.bf16.vlgmr.msra.gmra.mrb[8].mxu0 %vm301_vm4, %v662_v24  ;;  %v1421_v24 = vpop.eup %1420 }
  0x76   : > { %1319 = vmatpush3.bf16.msk.msra.mxu0 %vm1876_vm3, %v1650_v18  ;;  %1320 = vmatprep.mubr.msk.bf16.mxu0 %vm1649_vm0, %v1648_v1  ;;  %v769_v18 = vmul.f32 1.442695, %v767_v14  ;;  %v940_v14 = vmax.f32 %v1957_v60, 0.0 }
  0x78   : > { %1432 = vpow2.f32 %v769_v18 }
  0x7d   : > { %1321 = vmatmul.mubr.msk.bf16.vlgmr.msra.gmra.mrb[12].mxu0 %vm301_vm4, %v841_v27  ;;  %v1423_v27 = vpop.eup %1422 }
 0x138   : > { %v339_v28 = vpop.f32.mrb[0].mxu0 }
 0x139   : > { %v1286_v29 = vpop.f32.mrb[1].mxu0 }
 0x13a   : > { %v342_v30 = vpop.f32.mrb[2].mxu0  ;;  %v1425_v29 = vpop.eup %1424 }
 0x13b   : > { %v346_v31 = vpack.c.bf16 %v342_v30, %v339_v28  ;;  %v1287_v32 = vpop.f32.mrb[3].mxu0  ;;  %v594_v28 = vadd.f32 1.0, %v1421_v24  ;;  %v595_v30 = vadd.f32 1.0, %v1423_v27 }
 0x13c   : > { %v415_v32 = vadd.f32 1.0, %v1425_v29 }
 0x13d   : > { %1289 = vmatpush3.bf16.msra.mxu1 %v346_v31  ;;  %v1427_v31 = vpop.eup %1426 }
 0x13e   : > { %1300 = vmatprep.subr.bf16.mxu1 %v1648_v1 }
 0x140   : > { %1291 = vmatmul.mubr.msk.bf16.vlgmr.msra.gmra.mrb[0].mxu1 %vm301_vm4, %v295_v17  ;;  %v521_v33 = vpop.f32.mrb[4].mxu0 }
 0x141   : > { %v1298_v34 = vpop.f32.mrb[5].mxu0  ;;  %1302 = vmatprep.mubr.msk.bf16.mxu1 %vm1649_vm0, %v1648_v1 }
 0x142   : > { %v524_v35 = vpop.f32.mrb[6].mxu0  ;;  %v1429_v34 = vpop.eup %1428 }
 0x143   : > { %v528_v36 = vpack.c.bf16 %v524_v35, %v521_v33  ;;  %v1299_v37 = vpop.f32.mrb[7].mxu0  ;;  %v416_v33 = vadd.f32 1.0, %v1427_v31  ;;  %v1431_v35 = vpop.eup %1430 }
 0x144   : > { %v1433_v37 = vpop.eup %1432 }
 0x145   : > { %1301 = vmatpush3.bf16.msra.mxu1 %v528_v36  ;;  %v952_v36 = vadd.f32 1.0, %v1429_v34 }
 0x146   : > { %1312 = vmatprep.subr.bf16.mxu1 %v1648_v1 }
 0x148   : > { %1303 = vmatmul.mubr.msk.bf16.vlgmr.msra.gmra.mrb[4].mxu1 %vm301_vm4, %v295_v17  ;;  %v700_v38 = vpop.f32.mrb[8].mxu0 }
 0x149   : > { %v1310_v39 = vpop.f32.mrb[9].mxu0  ;;  %1314 = vmatprep.mubr.msk.bf16.mxu1 %vm1649_vm0, %v1648_v1 }
 0x14a   : > { %v703_v40 = vpop.f32.mrb[10].mxu0 }
 0x14b   : > { %v707_v41 = vpack.c.bf16 %v703_v40, %v700_v38  ;;  %v1311_v42 = vpop.f32.mrb[11].mxu0  ;;  %v953_v38 = vadd.f32 1.0, %v1431_v35  ;;  %v773_v40 = vadd.f32 1.0, %v1433_v37 }
 0x14c   : > { %v1974_v42 = vmul.f32 %v1869_v11, %v1941_v48 }
 0x14d   : > { %1313 = vmatpush3.bf16.msra.mxu1 %v707_v41 }
 0x14e   : > { %1324 = vmatprep.subr.bf16.mxu1 %v1648_v1  ;;  %v405_v0 = vsub.f32 %v403_v53, %v1974_v42 }
 0x150   : > { %1315 = vmatmul.mubr.msk.bf16.vlgmr.msra.gmra.mrb[8].mxu1 %vm301_vm4, %v295_v17  ;;  %v879_v43 = vpop.f32.mrb[12].mxu0 }
 0x151   : > { %v1322_v44 = vpop.f32.mrb[13].mxu0  ;;  %1326 = vmatprep.mubr.msk.bf16.mxu1 %vm1649_vm0, %v1648_v1 }
 0x152   : > { %v882_v45 = vpop.f32.mrb[14].mxu0  ;;  %v1982_v44 = vmul.f32 %v1891_v19, %v1947_v50 }
 0x153   : > { %v886_v46 = vpack.c.bf16 %v882_v45, %v879_v43  ;;  %v1323_v47 = vpop.f32.mrb[15].mxu0  ;;  %v1978_v43 = vmul.f32 %v1872_v12, %v1944_v49 }
 0x154   : > { %v582_v47 = vmax.f32 %v1947_v50, 0.0 }
 0x155   : > { %1325 = vmatpush3.bf16.msra.mxu1 %v886_v46  ;;  %v1986_v46 = vmul.f32 %v1894_v20, %v1950_v51  ;;  %v406_v4 = vsub.f32 %v404_v56, %v1978_v43 }
 0x156   : > { %v584_v58 = vsub.f32 %v582_v47, %v1982_v44  ;;  %v762_v47 = vmax.f32 %v1968_v7, 0.0 }
 0x157   : > { %v585_v59 = vsub.f32 %v583_v52, %v1986_v46 }
 0x158   : > { %1327 = vmatmul.mubr.msk.bf16.vlgmr.msra.gmra.mrb[12].mxu1 %vm301_vm4, %v295_v17  ;;  %v768_v17 = vsub.f32 0.0, %v766_v13 }
 0x15a   : > { %v771_v21 = vmul.f32 1.442695, %v768_v17  ;;  %v941_v17 = vmax.f32 %v1960_v61, 0.0 }
 0x15c   : > { %1434 = vpow2.f32 %v771_v21 }
 0x15d   : > { %1436 = vlog2.f32 %v594_v28  ;;  %v942_v28 = vsub.f32 %v940_v14, %v1998_v6 }
 0x15e   : > { %1438 = vlog2.f32 %v595_v30 }
 0x15f   : > { %1440 = vlog2.f32 %v415_v32  ;;  %v2012_v32 = vmul.f32 %v1905_v22, %v1963_v62 }
 0x160   : > { %1442 = vlog2.f32 %v416_v33  ;;  %v2016_v33 = vmul.f32 %v1908_v23, %v1968_v7 }
 0x161   : > { %1444 = vlog2.f32 %v952_v36  ;;  %v943_v36 = vsub.f32 %v941_v17, %v2002_v8 }
 0x162   : > { %1446 = vlog2.f32 %v953_v38 }
 0x163   : > { %1448 = vlog2.f32 %v773_v40  ;;  %v761_v40 = vmax.f32 %v1963_v62, 0.0 }
 0x165   : > { %v763_v53 = vsub.f32 %v761_v40, %v2012_v32 }
 0x166   : > { %v1435_v39 = vpop.eup %1434 }
 0x167   : > { %v774_v41 = vadd.f32 1.0, %v1435_v39  ;;  %v1437_v45 = vpop.eup %1436 }
 0x168   : > { %v1439_v54 = vpop.eup %1438  ;;  %v597_v55 = vmul.f32 0.6931472, %v1437_v45 }
 0x169   : > { %1450 = vlog2.f32 %v774_v41  ;;  %v1441_v57 = vpop.eup %1440  ;;  %v599_v63 = vmul.f32 0.6931472, %v1439_v54 }
 0x16a   : > { %v1443_v2 = vpop.eup %1442  ;;  %v418_v5 = vmul.f32 0.6931472, %v1441_v57  ;;  %v600_v9 = vadd.f32 %v597_v55, %v584_v58  ;;  %v764_v57 = vsub.f32 %v762_v47, %v2016_v33 }
 0x16b   : > { %v601_v10 = vadd.f32 %v599_v63, %v585_v59  ;;  %v420_v13 = vmul.f32 0.6931472, %v1443_v2  ;;  %v1445_v15 = vpop.eup %1444 }
 0x16c   : > { %v421_v16 = vadd.f32 %v418_v5, %v405_v0  ;;  %v1447_v18 = vpop.eup %1446  ;;  %v605_v21 = vsel %vm301_vm4, %v600_v9, 0.0  ;;  %v955_v37 = vmul.f32 0.6931472, %v1445_v15  ;;  %v391_v5 = vmul.f32 961.0, %v1869_v11 }
 0x16d   : > { %v606_v24 = vsel %vm301_vm4, %v601_v10, 0.0  ;;  %v422_v27 = vadd.f32 %v420_v13, %v406_v4  ;;  %v1449_v29 = vpop.eup %1448  ;;  %v957_v38 = vmul.f32 0.6931472, %v1447_v18  ;;  %v392_v9 = vmul.f32 961.0, %v1872_v12 }
 0x16e   : > { %v607_v30 = vadd.f32 %v606_v24, %v605_v21  ;;  %v426_v31 = vsel %vm301_vm4, %v421_v16, 0.0  ;;  %v958_v41 = vadd.f32 %v955_v37, %v942_v28  ;;  %v776_v52 = vmul.f32 0.6931472, %v1449_v29 }
 0x16f   : > { %v427_v35 = vsel %vm301_vm4, %v422_v27, 0.0  ;;  %v959_v45 = vadd.f32 %v957_v38, %v943_v36  ;;  %v458_v24 = vadd.f32 %v1869_v11, %v1941_v48  ;;  %v570_v28 = vmul.f32 961.0, %v1891_v19 }
 0x170   : > { %608 = vadd.xlane.f32.xlu1 %v607_v30  ;;  %v428_v39 = vadd.f32 %v427_v35, %v426_v31  ;;  %v963_v55 = vsel %vm301_vm4, %v958_v41, 0.0  ;;  %v779_v59 = vadd.f32 %v776_v52, %v763_v53  ;;  %v459_v31 = vadd.f32 %v1872_v12, %v1944_v49 }
 0x171   : > { %v964_v56 = vsel %vm301_vm4, %v959_v45, 0.0  ;;  %v637_v53 = vadd.f32 %v1891_v19, %v1947_v50  ;;  %v749_v12 = vmul.f32 961.0, %v1905_v22  ;;  %v750_v19 = vmul.f32 961.0, %v1908_v23 }
 0x172   : > { %429 = vadd.xlane.f32.xlu0 %v428_v39  ;;  %v965_v58 = vadd.f32 %v964_v56, %v963_v55  ;;  %v784_v0 = vsel %vm301_vm4, %v779_v59, 0.0 }
 0x173   : > { %v1451_v34 = vpop.eup %1450 }
 0x174   : > { %v778_v54 = vmul.f32 0.6931472, %v1451_v34  ;;  %966 = vadd.xlane.f32.xlu1 %v965_v58  ;;  %v571_v34 = vmul.f32 961.0, %v1894_v20 }
 0x176   : > { %v780_v63 = vadd.f32 %v778_v54, %v764_v57 }
 0x178   : > { %v785_v2 = vsel %vm301_vm4, %v780_v63, 0.0 }
 0x179   : > { %v786_v4 = vadd.f32 %v785_v2, %v784_v0  ;;  %v638_v0 = vadd.f32 %v1894_v20, %v1950_v51  ;;  %v816_v20 = vadd.f32 %v1905_v22, %v1963_v62  ;;  %v928_v51 = vmul.f32 961.0, %v1919_v25 }
 0x17a   : > { %v929_v22 = vmul.f32 961.0, %v1922_v26 }
 0x17b   : > { %787 = vadd.xlane.f32.xlu0 %v786_v4 }
 0x213   : > { %v384_v10 = vpop.f32.mrb[0].mxu1 }
 0x214   : > { %v393_v13 = vsub.f32 %v384_v10, %v391_v5  ;;  %v1292_v14 = vpop.f32.mrb[1].mxu1 }
 0x215   : > { %v387_v15 = vpop.f32.mrb[2].mxu1 }
 0x216   : > { %v395_v16 = vand.u32 2147483647, %v393_v13  ;;  %v394_v17 = vsub.f32 %v387_v15, %v392_v9  ;;  %v1293_v18 = vpop.f32.mrb[3].mxu1 }
 0x218   : > { %v397_v21 = vmul.f32 0.0052029137, %v395_v16  ;;  %v396_v27 = vand.u32 2147483647, %v394_v17 }
 0x21a   : > { %v399_v29 = vadd.f32 1.0, %v397_v21  ;;  %v398_v30 = vmul.f32 0.0052029137, %v396_v27 }
 0x21b   : > { %v563_v35 = vpop.f32.mrb[4].mxu1 }
 0x21c   : > { %v441_v36 = vmul.f32 %v1974_v42, %v399_v29  ;;  %v460_v37 = vmul.f32 %v458_v24, %v399_v29  ;;  %v400_v38 = vadd.f32 1.0, %v398_v30  ;;  %v572_v39 = vsub.f32 %v563_v35, %v570_v28  ;;  %v1304_v40 = vpop.f32.mrb[5].mxu1 }
 0x21d   : > { %v566_v41 = vpop.f32.mrb[6].mxu1  ;;  %v817_v35 = vadd.f32 %v1908_v23, %v1968_v7  ;;  %v995_v7 = vadd.f32 %v1919_v25, %v1957_v60 }
 0x21e   : > { %v442_v11 = vmul.f32 %v1978_v43, %v400_v38  ;;  %v461_v48 = vmul.f32 %v459_v31, %v400_v38  ;;  %v574_v45 = vand.u32 2147483647, %v572_v39  ;;  %v573_v47 = vsub.f32 %v566_v41, %v571_v34  ;;  %v1305_v52 = vpop.f32.mrb[7].mxu1  ;;  %v430_v41 = vpop.xlane.xlu0 %429 }
 0x21f   : > { %v462_v49 = vsel %vm301_vm4, %v460_v37, 0.0  ;;  %v443_v42 = vsel %vm301_vm4, %v441_v36, 0.0 }
 0x220   : > { %v576_v54 = vmul.f32 0.0052029137, %v574_v45  ;;  %v575_v55 = vand.u32 2147483647, %v573_v47  ;;  %v463_v56 = vsel %vm301_vm4, %v461_v48, 0.0  ;;  %v444_v57 = vsel %vm301_vm4, %v442_v11, 0.0 }
 0x221   : > { %v464_v43 = vadd.f32 %v463_v56, %v462_v49  ;;  %v445_v58 = vadd.f32 %v444_v57, %v443_v42  ;;  %v431_v48 = vrot.slane %v430_v41, 4 }
 0x222   : > { %v578_v59 = vadd.f32 1.0, %v576_v54  ;;  %v577_v63 = vmul.f32 0.0052029137, %v575_v55 }
 0x223   : > { %v742_v50 = vpop.f32.mrb[8].mxu1  ;;  %465 = vadd.xlane.f32.xlu1 %v464_v43  ;;  %446 = vadd.xlane.f32.xlu0 %v445_v58  ;;  %v432_v49 = vadd.f32 %v431_v48, %v430_v41 }
 0x224   : > { %v620_v2 = vmul.f32 %v1982_v44, %v578_v59  ;;  %v639_v4 = vmul.f32 %v637_v53, %v578_v59  ;;  %v579_v5 = vadd.f32 1.0, %v577_v63  ;;  %v751_v9 = vsub.f32 %v742_v50, %v749_v12  ;;  %v1316_v10 = vpop.f32.mrb[9].mxu1 }
 0x225   : > { %v745_v13 = vpop.f32.mrb[10].mxu1  ;;  %v996_v59 = vadd.f32 %v1922_v26, %v1960_v61  ;;  %v433_v25 = vrot.slane %v432_v49, 2 }
 0x226   : > { %v621_v14 = vmul.f32 %v1986_v46, %v579_v5  ;;  %v640_v15 = vmul.f32 %v638_v0, %v579_v5  ;;  %v753_v16 = vand.u32 2147483647, %v751_v9  ;;  %v752_v17 = vsub.f32 %v745_v13, %v750_v19  ;;  %v1317_v18 = vpop.f32.mrb[11].mxu1 }
 0x227   : > { %v641_v21 = vsel %vm301_vm4, %v639_v4, 0.0  ;;  %v622_v44 = vsel %vm301_vm4, %v620_v2, 0.0  ;;  %v434_v2 = vadd.f32 %v433_v25, %v432_v49 }
 0x228   : > { %v755_v24 = vmul.f32 0.0052029137, %v753_v16  ;;  %v754_v27 = vand.u32 2147483647, %v752_v17  ;;  %v642_v28 = vsel %vm301_vm4, %v640_v15, 0.0  ;;  %v623_v29 = vsel %vm301_vm4, %v621_v14, 0.0  ;;  %v609_v14 = vpop.xlane.xlu1 %608  ;;  %v788_v17 = vpop.xlane.xlu0 %787 }
 0x229   : > { %v643_v46 = vadd.f32 %v642_v28, %v641_v21  ;;  %v624_v30 = vadd.f32 %v623_v29, %v622_v44  ;;  %v435_v13 = vrot.slane %v434_v2, 1  ;;  %v610_v15 = vrot.slane %v609_v14, 4 }
 0x22a   : > { %v757_v31 = vadd.f32 1.0, %v755_v24  ;;  %v756_v34 = vmul.f32 0.0052029137, %v754_v27 }
 0x22b   : > { %v921_v62 = vpop.f32.mrb[12].mxu1  ;;  %644 = vadd.xlane.f32.xlu1 %v643_v46  ;;  %625 = vadd.xlane.f32.xlu0 %v624_v30 }
 0x22c   : > { %v799_v36 = vmul.f32 %v2012_v32, %v757_v31  ;;  %v818_v37 = vmul.f32 %v816_v20, %v757_v31  ;;  %v758_v38 = vadd.f32 1.0, %v756_v34  ;;  %v930_v39 = vsub.f32 %v921_v62, %v928_v51  ;;  %v1328_v40 = vpop.f32.mrb[13].mxu1  ;;  %v967_v16 = vpop.xlane.xlu1 %966 }
 0x22d   : > { %v924_v11 = vpop.f32.mrb[14].mxu1  ;;  %v789_v20 = vrot.slane %v788_v17, 4  ;;  %v968_v62 = vrot.slane %v967_v16, 4 }
 0x22e   : > { %v800_v45 = vmul.f32 %v2016_v33, %v758_v38  ;;  %v819_v47 = vmul.f32 %v817_v35, %v758_v38  ;;  %v932_v52 = vand.u32 2147483647, %v930_v39  ;;  %v931_v53 = vsub.f32 %v924_v11, %v929_v22  ;;  %v1329_v23 = vpop.f32.mrb[15].mxu1 }
 0x22f   : > { %v801_v12 = vsel %vm301_vm4, %v799_v36, 0.0  ;;  %v820_v32 = vsel %vm301_vm4, %v818_v37, 0.0  ;;  %v790_v46 = vadd.f32 %v789_v20, %v788_v17  ;;  %v969_v23 = vadd.f32 %v968_v62, %v967_v16 }
 0x230   : > { %v934_v42 = vmul.f32 0.0052029137, %v932_v52  ;;  %v933_v54 = vand.u32 2147483647, %v931_v53  ;;  %v802_v55 = vsel %vm301_vm4, %v800_v45, 0.0  ;;  %v821_v56 = vsel %vm301_vm4, %v819_v47, 0.0 }
 0x231   : > { %v803_v57 = vadd.f32 %v802_v55, %v801_v12  ;;  %v822_v33 = vadd.f32 %v821_v56, %v820_v32  ;;  %v791_v36 = vrot.slane %v790_v46, 2 }
 0x232   : > { %v936_v43 = vadd.f32 1.0, %v934_v42  ;;  %v935_v58 = vmul.f32 0.0052029137, %v933_v54  ;;  %v970_v54 = vrot.slane %v969_v23, 2 }
 0x233   : > { %804 = vadd.xlane.f32.xlu1 %v803_v57  ;;  %823 = vadd.xlane.f32.xlu0 %v822_v33 }
 0x234   : > { %v978_v60 = vmul.f32 %v1998_v6, %v936_v43  ;;  %v997_v63 = vmul.f32 %v995_v7, %v936_v43  ;;  %v937_v0 = vadd.f32 1.0, %v935_v58  ;;  %v436_v6 = vadd.f32 %v435_v13, %v434_v2 }
 0x235   : > { %v792_v7 = vadd.f32 %v791_v36, %v790_v46 }
 0x236   : > { %v979_v19 = vmul.f32 %v2002_v8, %v937_v0  ;;  %v998_v50 = vmul.f32 %v996_v59, %v937_v0  ;;  %v999_v4 = vsel %vm301_vm4, %v997_v63, 0.0  ;;  %v980_v9 = vsel %vm301_vm4, %v978_v60, 0.0  ;;  %1330 = vpush %v436_v6 }
 0x237   : > { %v611_v8 = vadd.f32 %v610_v15, %v609_v14  ;;  %v793_v57 = vrot.slane %v792_v7, 1 }
 0x238   : > { %v1000_v5 = vsel %vm301_vm4, %v998_v50, 0.0  ;;  %v981_v10 = vsel %vm301_vm4, %v979_v19, 0.0  ;;  %v971_v19 = vadd.f32 %v970_v54, %v969_v23 }
 0x239   : > { %v1001_v26 = vadd.f32 %v1000_v5, %v999_v4  ;;  %v982_v61 = vadd.f32 %v981_v10, %v980_v9  ;;  %v612_v18 = vrot.slane %v611_v8, 2  ;;  %v794_v4 = vadd.f32 %v793_v57, %v792_v7 }
 0x23b   : > { %1002 = vadd.xlane.f32.xlu1 %v1001_v26  ;;  %983 = vadd.xlane.f32.xlu0 %v982_v61  ;;  %v613_v27 = vadd.f32 %v612_v18, %v611_v8  ;;  %v972_v61 = vrot.slane %v971_v19, 1 }
 0x23d   : > { %v614_v34 = vrot.slane %v613_v27, 1 }
 0x23f   : > { %v615_v48 = vadd.f32 %v614_v34, %v613_v27  ;;  %v1229_v34 = vsel %vm423_vm6, 1.0, %v1648_v1 }
 0x267   : > { %s1331_s26 = spop %1330 }
 0x2b0   : > { %v466_v51 = vpop.xlane.xlu1 %465  ;;  %v447_v21 = vpop.xlane.xlu0 %446 }
 0x2b1   : > { %v467_v44 = vrot.slane %v466_v51, 4  ;;  %v448_v24 = vrot.slane %v447_v21, 4 }
 0x2b3   : > { %v468_v28 = vadd.f32 %v467_v44, %v466_v51  ;;  %v449_v29 = vadd.f32 %v448_v24, %v447_v21  ;;  %v973_v21 = vadd.f32 %v972_v61, %v971_v19 }
 0x2b5   : > { %v469_v30 = vrot.slane %v468_v28, 2  ;;  %v450_v31 = vrot.slane %v449_v29, 2 }
 0x2b7   : > { %v451_v35 = vadd.f32 %v450_v31, %v449_v29  ;;  %v470_v22 = vadd.f32 %v469_v30, %v468_v28  ;;  %v1238_v30 = vsel %vm602_vm5, 1.0, %v1648_v1 }
 0x2b8   : > { %v645_v37 = vpop.xlane.xlu1 %644  ;;  %v626_v38 = vpop.xlane.xlu0 %625 }
 0x2b9   : > { %v646_v39 = vrot.slane %v645_v37, 4  ;;  %v627_v40 = vrot.slane %v626_v38, 4  ;;  %v452_v41 = vrot.slane %v451_v35, 1  ;;  %v471_v11 = vrot.slane %v470_v22, 1 }
 0x2bb   : > { %v647_v45 = vadd.f32 %v646_v39, %v645_v37  ;;  %v628_v47 = vadd.f32 %v627_v40, %v626_v38  ;;  %v453_v52 = vadd.f32 %v452_v41, %v451_v35  ;;  %v472_v53 = vadd.f32 %v471_v11, %v470_v22 }
 0x2bc   : > { %v438_v35 = vstv %s1331_s26  ;;  %v1247_v22 = vsel %vm781_vm7, 1.0, %v1648_v1  ;;  %v2090_v40 = vsel %vm960_vm8, 1.0, %v1648_v1  ;;  %s2105_s26 = scalar_lea.hbm %s2241_s2, %s2097_s20 }
 0x2bd   : > { %v648_v12 = vrot.slane %v647_v45, 2  ;;  %v629_v32 = vrot.slane %v628_v47, 2  ;;  %1332 = vpush %v453_v52  ;;  %v439_v37 = vmul.f32 %v1229_v34, %v438_v35 }
 0x2be   : > { %1334 = vpush %v472_v53 }
 0x2bf   : > { %1336 = vpush %v615_v48  ;;  %v630_v49 = vadd.f32 %v629_v32, %v628_v47  ;;  %v649_v42 = vadd.f32 %v648_v12, %v647_v45 }
 0x2c0   : > { %v805_v55 = vpop.xlane.xlu1 %804  ;;  %v824_v56 = vpop.xlane.xlu0 %823 }
 0x2c1   : > { %v806_v33 = vrot.slane %v805_v55, 4  ;;  %v825_v43 = vrot.slane %v824_v56, 4  ;;  %v631_v58 = vrot.slane %v630_v49, 1  ;;  %v650_v59 = vrot.slane %v649_v42, 1 }
 0x2c3   : > { %v807_v25 = vadd.f32 %v806_v33, %v805_v55  ;;  %v826_v60 = vadd.f32 %v825_v43, %v824_v56  ;;  %v632_v63 = vadd.f32 %v631_v58, %v630_v49  ;;  %v651_v0 = vadd.f32 %v650_v59, %v649_v42 }
 0x2c5   : > { %v808_v50 = vrot.slane %v807_v25, 2  ;;  %v827_v2 = vrot.slane %v826_v60, 2  ;;  %1338 = vpush %v632_v63 }
 0x2c6   : > { %1340 = vpush %v651_v0 }
 0x2c7   : > { %1342 = vpush %v794_v4  ;;  %v809_v5 = vadd.f32 %v808_v50, %v807_v25  ;;  %v828_v9 = vadd.f32 %v827_v2, %v826_v60 }
 0x2c8   : > { %v1003_v10 = vpop.xlane.xlu1 %1002  ;;  %v984_v26 = vpop.xlane.xlu0 %983 }
 0x2c9   : > { %v1004_v13 = vrot.slane %v1003_v10, 4  ;;  %v985_v6 = vrot.slane %v984_v26, 4  ;;  %v810_v14 = vrot.slane %v809_v5, 1  ;;  %v829_v15 = vrot.slane %v828_v9, 1 }
 0x2cb   : > { %v1005_v8 = vadd.f32 %v1004_v13, %v1003_v10  ;;  %v986_v16 = vadd.f32 %v985_v6, %v984_v26  ;;  %v811_v17 = vadd.f32 %v810_v14, %v809_v5  ;;  %v830_v18 = vadd.f32 %v829_v15, %v828_v9 }
 0x2cd   : > { %v1006_v20 = vrot.slane %v1005_v8, 2  ;;  %v987_v51 = vrot.slane %v986_v16, 2  ;;  %1344 = vpush %v811_v17 }
 0x2ce   : > { %1346 = vpush %v830_v18 }
 0x2cf   : > { %v1007_v44 = vadd.f32 %v1006_v20, %v1005_v8  ;;  %v988_v24 = vadd.f32 %v987_v51, %v986_v16  ;;  %1348 = vpush %v973_v21 }
 0x2d1   : > { %v989_v27 = vrot.slane %v988_v24, 1  ;;  %v1008_v28 = vrot.slane %v1007_v44, 1 }
 0x2d3   : > { %v990_v29 = vadd.f32 %v989_v27, %v988_v24  ;;  %v1009_v46 = vadd.f32 %v1008_v28, %v1007_v44 }
 0x2d5   : > { %1350 = vpush %v990_v29 }
 0x2d6   : > { %1352 = vpush %v1009_v46 }
 0x2ee   : > { %s2076_s23 = spop %1332 }
 0x2ef   : > { %s2078_s25 = spop %1334  ;;  %v455_v48 = vstv %s2076_s23 }
 0x2f0   : > { %s1337_s9 = spop %1336  ;;  %v474_v45 = vstv %s2078_s25  ;;  %v456_v12 = vmul.f32 %v1229_v34, %v455_v48  ;;  %s266_s25 = scalar_lea.vmem [#allocation8], %s1841_s10 }
 0x2f1   : > { %v617_v31 = vstv %s1337_s9  ;;  %v475_v42 = vmul.f32 %v1229_v34, %v474_v45  ;;  %s2112_s9 = sshll.u32 %s266_s25, 4  ;;  %s2154_s9 = int_to_ptr.vmem [resolvable:$true] %s2112_s9 }
 0x2f2   : > { %v618_v36 = vmul.f32 %v1238_v30, %v617_v31 }
 0x2f4   : > { %v619_v41 = vadd.f32 %v618_v36, %v439_v37 }
 0x2f6   : > { %s1339_s22 = spop %1338 }
 0x2f7   : > { %s2081_s8 = spop %1340  ;;  %v634_v39 = vstv %s1339_s22 }
 0x2f8   : > { %s1343_s7 = spop %1342  ;;  %v653_v11 = vstv %s2081_s8  ;;  %v635_v53 = vmul.f32 %v1238_v30, %v634_v39  ;;  %s2247_s8 = scalar_lea.vmem [#allocation10], %s1841_s10 }
 0x2f9   : > { %v796_v62 = vstv %s1343_s7  ;;  %v654_v1 = vmul.f32 %v1238_v30, %v653_v11  ;;  %s2120_s7 = sshll.u32 %s2247_s8, 4  ;;  %s2163_s7 = int_to_ptr.vmem [resolvable:$true] %s2120_s7 }
 0x2fa   : > { %v797_v38 = vmul.f32 %v1247_v22, %v796_v62  ;;  %v636_v55 = vadd.f32 %v635_v53, %v456_v12 }
 0x2fb   : > { %v655_v56 = vadd.f32 %v654_v1, %v475_v42 }
 0x2fc   : > { %v798_v3 = vadd.f32 %v797_v38, %v619_v41 }
 0x2fe   : > { %s1345_s5 = spop %1344 }
 0x2ff   : > { %s1347_s14 = spop %1346  ;;  %v813_v47 = vstv %s1345_s5  ;;  %s1019_s5 = scalar_lea.sflag [#allocation4], %s1841_s10 }
 0x300   : > { %s1349_s12 = spop %1348  ;;  %v832_v23 = vstv %s1347_s14  ;;  %v814_v32 = vmul.f32 %v1247_v22, %v813_v47  ;;  %s1512_s14 = scalar_lea.vmem %s2107_s30, 16 }
 0x301   : > { %v975_v52 = vstv %s1349_s12  ;;  %v833_v54 = vmul.f32 %v1247_v22, %v832_v23  ;;  %p1513_p13 = scmp.ne.s32.totalorder %s2107_s30, %s1512_s14  ;;  %s1651_s12 = smov [#allocation7]  }
 0x302   : > { %v976_v7 = vmul.f32 %v2090_v40, %v975_v52  ;;  %v815_v33 = vadd.f32 %v814_v32, %v636_v55 }
 0x303   : > { %p1514_p12 = pnand %p1513_p13, %p2257_p1 }
 0x304   : > { %v977_v49 = vadd.f32 %v976_v7, %v798_v3 }
 0x305   : > { %p1515_p10 = pneg %p1514_p12 }
 0x306   : > { %s1351_s23 = spop %1350  ;;  %1015 = vst.msk [vmem:[%s260_s6] sm:$0x1] %vm1014_vm9, %v977_v49  ;;  %s1516_s6 = sshll.u32 %s1651_s12, 4  ;;  %s1517_s6 = int_to_ptr.vmem [resolvable:$false] %s1516_s6 }
 0x307   : > { %v992_v57 = vstv %s1351_s23  ;;  %s2115_s22 = spop %1352  ;;  %s1518_s29 = scalar_lea.vmem %s1517_s6, 32 }
 0x308   : > { %v993_v43 = vmul.f32 %v2090_v40, %v992_v57  ;;  %v1011_v58 = vstv %s2115_s22  ;;  %p1519_p5 = scmp.lt.s32.totalorder %s2107_s30, %s1517_s6  ;;  %p1520_p7 = scmp.lt.s32.totalorder %s1518_s29, %s1512_s14 }
 0x30a   : > { %p1521_p9 = por %p1520_p7, %p1519_p5 }
 0x30c   : > { %p1522_p11 = pnand %p1521_p9, %p1515_p10 }
 0x30e   : > { %1525 = shalt.err (!%p1522_p11)
}
 0x30f   : > { %s1526_s13 = scalar_lea.hbm %s2105_s26, 16  ;;  %s1530_s12 = scalar_lea.hbm %s2241_s2, 32 }
 0x310   : > { %p1527_p3 = scmp.ne.s32.totalorder %s2105_s26, %s1526_s13  ;;  %p1531_p2 = scmp.lt.u32.totalorder %s2105_s26, %s2241_s2 }
 0x311   : > { %p1532_p4 = scmp.lt.u32.totalorder %s1530_s12, %s1526_s13  ;;  %p1534_p13 = scmp.lt.u32.totalorder %s1526_s13, %s2105_s26 }
 0x312   : > { %p1528_p8 = pnand %p1527_p3, %p2257_p1 }
 0x313   : > { %p1533_p6 = por %p1532_p4, %p1531_p2 }
 0x314   : > { %p1529_p0 = pneg %p1528_p8 }
 0x315   : > { %p1535_p12 = por %p1534_p13, %p1533_p6 }
 0x317   : > { %p1536_p10 = pnand %p1535_p12, %p1529_p0 }
 0x319   : > { %1539 = shalt.err (!%p1536_p10)
}
 0x31a   : > { %1358 = dma.vmem_to_hbm [thread:$0]  (%p2257_p1), %s2107_s30, 16, %s2105_s26, %s1019_s5   ;;  %v834_v59 = vadd.f32 %v833_v54, %v655_v56  ;;  %v1012_v25 = vmul.f32 %v2090_v40, %v1011_v58  ;;  %v994_v60 = vadd.f32 %v993_v43, %v815_v33 }
 0x31b   : > { %s2151_s29 = scalar_lea.hbm %s2242_s3, %s2097_s20  ;;  %s2160_s22 = scalar_lea.hbm %s2243_s4, %s2097_s20 }
 0x31c   : > { %v1013_v63 = vadd.f32 %v1012_v25, %v834_v59  ;;  %1016 = vst.msk [vmem:[%s266_s25] sm:$0x1] %vm1014_vm9, %v994_v60  ;;  %s2170_s30 = scalar_lea.sflag [#allocation9], %s1022_s11  ;;  %s1540_s26 = scalar_lea.vmem %s2154_s9, 16 }
 0x31d   : > { %p1541_p5 = scmp.ne.s32.totalorder %s2154_s9, %s1540_s26  ;;  %s1652_s5 = smov [#allocation8]  }
 0x31e   : > { %s1544_s12 = sshll.u32 %s1652_s5, 4  ;;  %s1545_s12 = int_to_ptr.vmem [resolvable:$false] %s1544_s12 }
 0x31f   : > { %p1542_p7 = pnand %p1541_p5, %p2257_p1  ;;  %s1546_s6 = scalar_lea.vmem %s1545_s12, 32 }
 0x320   : > { %p1547_p11 = scmp.lt.s32.totalorder %s2154_s9, %s1545_s12  ;;  %p1548_p3 = scmp.lt.s32.totalorder %s1546_s6, %s1540_s26 }
 0x321   : > { %p1543_p9 = pneg %p1542_p7 }
 0x322   : > { %p1549_p8 = por %p1548_p3, %p1547_p11 }
 0x324   : > { %p1550_p0 = pnand %p1549_p8, %p1543_p9 }
 0x326   : > { %1553 = shalt.err (!%p1550_p0)
}
 0x327   : > { %s1554_s19 = scalar_lea.hbm %s2151_s29, 16  ;;  %s1558_s25 = scalar_lea.hbm %s2242_s3, 32 }
 0x328   : > { %p1555_p2 = scmp.ne.s32.totalorder %s2151_s29, %s1554_s19  ;;  %p1559_p13 = scmp.lt.u32.totalorder %s2151_s29, %s2242_s3 }
 0x329   : > { %p1560_p12 = scmp.lt.u32.totalorder %s1558_s25, %s1554_s19  ;;  %p1562_p5 = scmp.lt.u32.totalorder %s1554_s19, %s2151_s29 }
 0x32a   : > { %p1556_p4 = pnand %p1555_p2, %p2257_p1 }
 0x32b   : > { %p1561_p10 = por %p1560_p12, %p1559_p13 }
 0x32c   : > { %p1557_p6 = pneg %p1556_p4 }
 0x32d   : > { %p1563_p7 = por %p1562_p5, %p1561_p10 }
 0x32f   : > { %p1564_p9 = pnand %p1563_p7, %p1557_p6 }
 0x331   : > { %1567 = shalt.err (!%p1564_p9)
}
 0x332   : > { %1359 = dma.vmem_to_hbm [thread:$0]  (%p2257_p1), %s2154_s9, 16, %s2151_s29, %s2170_s30  }
 0x333   : > { %s2258_s13 = scalar_lea.vmem [#allocation10], %s1841_s10  ;;  %s1568_s23 = scalar_lea.vmem %s2163_s7, 16 }
 0x334   : > { %1017 = vst.msk [vmem:[%s2258_s13] sm:$0x1] %vm1014_vm9, %v1013_v63  ;;  %p1569_p11 = scmp.ne.s32.totalorder %s2163_s7, %s1568_s23  ;;  %s1653_s26 = smov [#allocation10]  }
 0x335   : > { %s1572_s5 = sshll.u32 %s1653_s26, 4  ;;  %s1573_s5 = int_to_ptr.vmem [resolvable:$false] %s1572_s5 }
 0x336   : > { %p1570_p3 = pnand %p1569_p11, %p2257_p1  ;;  %s1574_s12 = scalar_lea.vmem %s1573_s5, 32 }
 0x337   : > { %p1575_p0 = scmp.lt.s32.totalorder %s2163_s7, %s1573_s5  ;;  %p1576_p2 = scmp.lt.s32.totalorder %s1574_s12, %s1568_s23 }
 0x338   : > { %p1571_p8 = pneg %p1570_p3 }
 0x339   : > { %p1577_p4 = por %p1576_p2, %p1575_p0 }
 0x33b   : > { %p1578_p6 = pnand %p1577_p4, %p1571_p8 }
 0x33d   : > { %1581 = shalt.err (!%p1578_p6)
}
 0x33e   : > { %s1582_s10 = scalar_lea.hbm %s2160_s22, 16  ;;  %s1586_s6 = scalar_lea.hbm %s2243_s4, 32 }
 0x33f   : > { %p1583_p13 = scmp.ne.s32.totalorder %s2160_s22, %s1582_s10  ;;  %p1587_p5 = scmp.lt.u32.totalorder %s2160_s22, %s2243_s4 }
 0x340   : > { %p1588_p7 = scmp.lt.u32.totalorder %s1586_s6, %s1582_s10  ;;  %p1590_p11 = scmp.lt.u32.totalorder %s1582_s10, %s2160_s22 }
 0x341   : > { %p1584_p12 = pnand %p1583_p13, %p2257_p1 }
 0x342   : > { %p1589_p9 = por %p1588_p7, %p1587_p5 }
 0x343   : > { %p1585_p10 = pneg %p1584_p12 }
 0x344   : > { %p1591_p3 = por %p1590_p11, %p1589_p9 }
 0x346   : > { %p1592_p8 = pnand %p1591_p3, %p1585_p10 }
 0x348   : > { %1595 = shalt.err (!%p1592_p8)
}
 0x349   : > { %1360 = dma.vmem_to_hbm [thread:$0]  (%p2257_p1), %s2163_s7, 16, %s2160_s22, %s2170_s30  }
 0x34a PF: > { %s1077_s11 = sand.u32 1, %s1630_s15   ;;  %p2259_p0 = scmp.ne.s32.totalorder %s2251_s28, 0 }
 0x34b   : > { %p2260_p2 = scmp.ge.s32.totalorder %s1642_s18, 2  ;;  %s1078_s25 = scalar_lea.sflag [#allocation4], %s1077_s11 }
 0x34d   : > { %p1372_p4 = pnand %p2260_p2, %p2259_p0 }
 0x34f   : > { %1621 = dma.done.wait (!%p1372_p4), %s1078_s25, 16  }
 0x350   : > { %1623 = vsyncadd (!%p1372_p4), %s1078_s25, 4294967280  ;;  %s2261_s8 = sadd.s32 4294967294, %s1642_s18  }
 0x351   : > { %s1085_s14 = sand.u32 1, %s2261_s8  }
 0x352   : > { %s1086_s13 = scalar_lea.sflag [#allocation9], %s1085_s14 }
 0x353   : > { %1625 = dma.done.wait (!%p1372_p4), %s1086_s13, 32  }
 0x354   : > { %1627 = vsyncadd (!%p1372_p4), %s1086_s13, 4294967264  ;;  %p24_p1 = scmp.ge.s32.totalorder %s1704_s21, 4   ;;  %s2262_s15 = smov %s1634_s16 }
 0x355   : > { %s2263_s16 = smov %s1638_s17  ;;  %s2264_s17 = smov %s1716_s24 }
 0x356   : > { %s2265_s18 = smov %s1704_s21  ;;  %26 = sbr.rel (!%p24_p1) target bundleno = 9 (0x9), region = 124 }
 0x35d   :  { %1098 = vsyncpa [#allocation3], 1 }
 0x35e   :  { %1100 = vsyncpa [#allocation3 + $0x1], 1 }
 0x35f   :  { %1101 = vsyncpa [#allocation6], 1 }
 0x360   :  { %1103 = vsyncpa [#allocation6 + $0x1], 1 }
 0x361   :  { %1104 = vsyncpa [#allocation4], 1 }
 0x362   :  { %1106 = vsyncpa [#allocation4 + $0x1], 1 }
 0x363   :  { %1107 = vsyncpa [#allocation9], 1 }
 0x364   :  { %1109 = vsyncpa [#allocation9 + $0x1], 1 }

</bundles_post_ra>
